<compile_context>
chip_gen: v6e
topology: v6e:2x2x1
jax: 0.10.0
libtpu: 0.0.40
codegen_flags: <defaults>
</compile_context>

<pallas_src>
import functools

import jax
import jax.numpy as jnp
from jax import lax
from jax.experimental import pallas as pl
from jax.experimental.pallas import tpu as pltpu


def _round_up(v, m):
    return ((v + m - 1) // m) * m


def _vmem_budget_bytes():
    """~80% of physical VMEM (generation-aware); conservative fallback."""
    phys = 64 * 1024 * 1024
    try:
        phys = int(pltpu.get_tpu_info().vmem_capacity_bytes)
    except Exception:
        pass
    return int(phys * 0.8)


def _nonlocal_kernel(x_ref, phi_ref, g_ref,
                     wt_ref, bt_ref, wo_ref, bo_ref, kbias_ref,
                     out_ref,
                     *, compute_dtype, masked, approx_recip):
    # x_ref:    (TN, Cp)   query tile, channels last (padded), network dtype
    # phi_ref:  (Mp, dip)  pooled-branch phi projection for this batch element
    # g_ref:    (Mp, dip)  pooled-branch g projection for this batch element
    # wt_ref:   (Cp, dip)  theta weight (softmax scale pre-folded), compute dtype
    # wo_ref:   (dip, Cp)  output 1x1-conv weight, compute dtype
    # bt/bo:    (1, dip) / (1, Cp) f32 biases
    # kbias_ref:(1, Mp)    additive key mask (0 valid, -1e30 padded), f32
    x = x_ref[...]

    # theta projection (f32 accumulate on the MXU, operands in compute dtype)
    theta = jnp.dot(x.astype(compute_dtype), wt_ref[...],
                    preferred_element_type=jnp.float32)
    theta = (theta + bt_ref[...].astype(jnp.float32)).astype(compute_dtype)

    # attention logits: contract last dims directly (no XLU transpose)
    s = lax.dot_general(theta, phi_ref[...],
                        dimension_numbers=(((1,), (1,)), ((), ())),
                        preferred_element_type=jnp.float32)
    if masked:  # static: one broadcast add masks the padded key columns
        s = s + kbias_ref[...]

    # softmax over pooled axis (f32 math, EUP reciprocal for the divide)
    s_max = jnp.max(s, axis=-1, keepdims=True)
    e = jnp.exp(s - s_max)
    denom = jnp.sum(e, axis=-1, keepdims=True)
    attn = (e * pl.reciprocal(denom, approx=approx_recip)).astype(compute_dtype)

    # aggregate values, output 1x1 conv, residual add (residual stays f32)
    t = jnp.dot(attn, g_ref[...],
                preferred_element_type=jnp.float32).astype(compute_dtype)
    y = jnp.dot(t, wo_ref[...], preferred_element_type=jnp.float32)
    y = y + bo_ref[...].astype(jnp.float32)
    out_ref[...] = (y + x.astype(jnp.float32)).astype(out_ref.dtype)


def nonlocal2d_forward(x, params, *, dim_inner, use_maxpool=True,
                       max_pool_stride=2, use_scale=True, tile_n=512,
                       data_format="NCHW", mxu_dtype=None,
                       approx_reciprocal=True):
    """NonLocal2d forward.  x: (B, C, H, W) if data_format=="NCHW" (like the
    PyTorch module) or (B, H, W, C) if "NHWC".  Returns same layout."""
    if data_format == "NCHW":
        B, C, H, W = x.shape
        x_nhwc = jnp.transpose(x, (0, 2, 3, 1))
    elif data_format == "NHWC":
        B, H, W, C = x.shape
        x_nhwc = x
    else:
        raise ValueError(f"unknown data_format {data_format!r}")

    N = H * W
    dtype = x.dtype
    compute_dtype = jnp.dtype(mxu_dtype) if mxu_dtype is not None else jnp.dtype(dtype)
    itemsize = jnp.dtype(dtype).itemsize
    c_itemsize = jnp.dtype(compute_dtype).itemsize

    (w_theta, b_theta, w_phi, b_phi, w_g, b_g, w_out, b_out) = params
    Co = w_out.shape[1]
    if Co != C:
        raise ValueError("residual add requires dim_out == dim_in")

    # fold the softmax scale into the theta projection (free, vs. an N*M pass)
    scale = float(dim_inner) ** (-0.5) if use_scale else 1.0
    w_theta_s = w_theta.astype(jnp.float32) * scale
    b_theta_s = b_theta.astype(jnp.float32) * scale

    x_flat = x_nhwc.reshape(B, N, C)

    # ---- hoisted pooled branch: maxpool + fused phi/g projection -------------
    if use_maxpool:
        s_ = max_pool_stride
        He, We = (H // s_) * s_, (W // s_) * s_          # floor, like nn.MaxPool2d
        Hm, Wm = He // s_, We // s_
        xp = x_nhwc[:, :He, :We, :].reshape(B, Hm, s_, Wm, s_, C).max(axis=(2, 4))
    else:
        Hm, Wm = H, W
        xp = x_nhwc
    M = Hm * Wm
    pool_flat = xp.reshape(B, M, C).astype(jnp.float32)

    # phi and g fused into a single (C, 2*dim_inner) matmul (XLA fuses this)
    w_pg = jnp.concatenate([w_phi, w_g], axis=1).astype(jnp.float32)
    b_pg = jnp.concatenate([b_phi, b_g], axis=1).astype(jnp.float32)
    pg = jnp.einsum('bmc,cd->bmd', pool_flat, w_pg) + b_pg       # (B, M, 2*di)
    phi = pg[..., :dim_inner].astype(compute_dtype)
    g = pg[..., dim_inner:].astype(compute_dtype)

    # ---- padding for lane-dense MXU feeds / stores ---------------------------
    Cp = _round_up(C, 128)
    dip = _round_up(dim_inner, 128)
    Mp = _round_up(M, 256) if M > 128 else _round_up(M, 128)   # 256-wide MXU tiles

    sub = {4: 8, 2: 16, 1: 32}.get(itemsize, 8)                # dtype-aware sublanes
    N_r = _round_up(N, sub)
    TN = min(_round_up(tile_n, sub), N_r)

    def vmem_need(tn):
        return (2 * tn * Cp * itemsize                      # x tile (2-buffered)
                + 2 * tn * Cp * itemsize                    # out tile
                + 2 * 2 * Mp * dip * c_itemsize             # phi + g blocks
                + 2 * 2 * Cp * dip * c_itemsize             # wt + wo
                + 2 * (dip + Cp + Mp) * 4                   # biases + key mask
                + 3 * tn * Mp * 4                           # logits / exp / attn
                + 3 * tn * dip * 4                          # theta / t temps
                + tn * Cp * 4)                              # f32 residual temp

    budget = _vmem_budget_bytes()
    while TN > sub and vmem_need(TN) > budget:
        TN = max(sub, _round_up(TN // 2, sub))
    Np = _round_up(N, TN)
    n_tiles = Np // TN
    vmem_limit = int(min(budget, max(32 * 1024 * 1024, 2 * vmem_need(TN))))

    def pad2(a, r, c):
        return jnp.pad(a, ((0, r - a.shape[0]), (0, c - a.shape[1])))

    def pad3(a, n, c):
        return jnp.pad(a, ((0, 0), (0, n - a.shape[1]), (0, c - a.shape[2])))

    x_p = pad3(x_flat, Np, Cp)
    phi_p = pad3(phi, Mp, dip)
    g_p = pad3(g, Mp, dip)
    wt = pad2(w_theta_s, Cp, dip).astype(compute_dtype)
    bt = pad2(b_theta_s, 1, dip)
    wo = pad2(w_out.astype(jnp.float32), dip, Cp).astype(compute_dtype)
    bo = pad2(b_out.astype(jnp.float32), 1, Cp)
    kbias = jnp.where(jnp.arange(Mp) < M, 0.0, -1e30).astype(jnp.float32).reshape(1, Mp)

    kernel = functools.partial(_nonlocal_kernel,
                               compute_dtype=compute_dtype,
                               masked=(Mp > M),
                               approx_recip=approx_reciprocal)

    flops = 2 * B * (Np * Cp * dip + 2 * Np * Mp * dip + Np * dip * Cp)
    bytes_accessed = (B * (2 * Np * Cp * itemsize + 2 * Mp * dip * c_itemsize)
                      + 2 * Cp * dip * c_itemsize + (dip + Cp + Mp) * 4)
    cost = pl.CostEstimate(flops=int(flops), transcendentals=int(B * Np * Mp),
                           bytes_accessed=int(bytes_accessed))

    const_spec = lambda shape: pl.BlockSpec(shape, lambda b, n: (0, 0))
    out_flat = pl.pallas_call(
        kernel,
        out_shape=jax.ShapeDtypeStruct((B, Np, Cp), dtype),
        grid_spec=pltpu.PrefetchScalarGridSpec(
            num_scalar_prefetch=0,
            grid=(B, n_tiles),
            in_specs=[
                pl.BlockSpec((pl.Squeezed(), TN, Cp), lambda b, n: (b, n, 0)),
                pl.BlockSpec((pl.Squeezed(), Mp, dip), lambda b, n: (b, 0, 0)),
                pl.BlockSpec((pl.Squeezed(), Mp, dip), lambda b, n: (b, 0, 0)),
                const_spec((Cp, dip)), const_spec((1, dip)),
                const_spec((dip, Cp)), const_spec((1, Cp)),
                const_spec((1, Mp)),
            ],
            out_specs=pl.BlockSpec((pl.Squeezed(), TN, Cp),
                                   lambda b, n: (b, n, 0)),
        ),
        compiler_params=pltpu.CompilerParams(
            dimension_semantics=("parallel", "parallel"),
            vmem_limit_bytes=vmem_limit),
        cost_estimate=cost,
    )(x_p, phi_p, g_p, wt, bt, wo, bo, kbias)

    # ---- crop padding, restore requested layout ------------------------------
    y = out_flat[:, :N, :Co].reshape(B, H, W, Co)
    if data_format == "NCHW":
        y = jnp.transpose(y, (0, 3, 1, 2))
    return y


def make_params(key, dim_in, dim_inner, dim_out, dtype=jnp.float32):
    """Deterministic init matching _init_modules: weight ~ N(0, 0.01), bias = 0.
    1x1 conv weight (out, in, 1, 1) is stored as a (in, out) matmul matrix."""
    k1, k2, k3, k4 = jax.random.split(key, 4)
    std = 0.01
    w_theta = std * jax.random.normal(k1, (dim_in, dim_inner), dtype)
    w_phi = std * jax.random.normal(k2, (dim_in, dim_inner), dtype)
    w_g = std * jax.random.normal(k3, (dim_in, dim_inner), dtype)
    w_out = std * jax.random.normal(k4, (dim_inner, dim_out), dtype)
    b_theta = jnp.zeros((1, dim_inner), dtype)
    b_phi = jnp.zeros((1, dim_inner), dtype)
    b_g = jnp.zeros((1, dim_inner), dtype)
    b_out = jnp.zeros((1, dim_out), dtype)
    return (w_theta, b_theta, w_phi, b_phi, w_g, b_g, w_out, b_out)


def _reference(x, params, *, dim_inner, max_pool_stride=2):
    """Plain-JAX reference mirroring the PyTorch forward (for sanity check)."""
    (w_theta, b_theta, w_phi, b_phi, w_g, b_g, w_out, b_out) = params
    B, C, H, W = x.shape
    s = max_pool_stride
    He, We = (H // s) * s, (W // s) * s
    pool_x = x[:, :, :He, :We].reshape(B, C, He // s, s, We // s, s).max(axis=(3, 5))

    def conv1x1(inp, w, b):  # inp (B,C,H,W), w (Cin,Cout)
        return jnp.einsum('bchw,cd->bdhw', inp, w) + b.reshape(1, -1, 1, 1)

    theta = conv1x1(x, w_theta, b_theta).reshape(B, dim_inner, -1)
    theta = jnp.transpose(theta, (0, 2, 1))                        # (B, N, Ci)
    phi = conv1x1(pool_x, w_phi, b_phi).reshape(B, dim_inner, -1)  # (B, Ci, M)
    g = conv1x1(pool_x, w_g, b_g).reshape(B, dim_inner, -1)        # (B, Ci, M)
    tp = jnp.matmul(theta, phi) * (dim_inner ** -0.5)              # (B, N, M)
    p = jax.nn.softmax(tp, axis=-1)
    p = jnp.transpose(p, (0, 2, 1))                                # (B, M, N)
    t = jnp.matmul(g, p).reshape(B, dim_inner, H, W)
    y = conv1x1(t, w_out, b_out)
    return y + x


if __name__ == "__main__":
    key = jax.random.PRNGKey(0)
    kx, kp = jax.random.split(key)

    B, C, H, W = 2, 4, 16, 16
    dim_in = dim_out = C
    dim_inner = 8

    x = jax.random.normal(kx, (B, C, H, W), jnp.float32)
    params = make_params(kp, dim_in, dim_inner, dim_out)

    ref = _reference(x, params, dim_inner=dim_inner)

    # exact-dtype (f32) path: strict parity with the PyTorch-style reference
    out = nonlocal2d_forward(x, params, dim_inner=dim_inner)
    out = jax.block_until_ready(out)
    assert out.shape == (B, dim_out, H, W)
    assert jnp.allclose(out, ref, atol=1e-4, rtol=1e-4), "mismatch vs reference (f32)"

    # bf16-MXU production fast path (operands bf16, f32 accumulation/softmax/residual)
    out_bf16 = nonlocal2d_forward(x, params, dim_inner=dim_inner,
                                  mxu_dtype=jnp.bfloat16)
    out_bf16 = jax.block_until_ready(out_bf16)
    assert jnp.allclose(out_bf16, ref, atol=1e-2, rtol=1e-2), "mismatch vs reference (bf16)"

    print("KERNEL_OK")
</pallas_src>

<mosaic_0001>
module attributes {stable_mosaic.version = 11 : i64} {
  func.func @_nonlocal_kernel(%arg0: i32, %arg1: i32, %arg2: memref<1x256x128xf32, #tpu.memory_space<vmem>>, %arg3: memref<1x128x128xf32, #tpu.memory_space<vmem>>, %arg4: memref<1x128x128xf32, #tpu.memory_space<vmem>>, %arg5: memref<128x128xf32, #tpu.memory_space<vmem>>, %arg6: memref<1x128xf32, #tpu.memory_space<vmem>>, %arg7: memref<128x128xf32, #tpu.memory_space<vmem>>, %arg8: memref<1x128xf32, #tpu.memory_space<vmem>>, %arg9: memref<1x128xf32, #tpu.memory_space<vmem>>, %arg10: memref<1x256x128xf32, #tpu.memory_space<vmem>>) attributes {dimension_semantics = [#tpu.dimension_semantics<parallel>, #tpu.dimension_semantics<parallel>], iteration_bounds = array<i64: 2, 1>, scalar_prefetch = 0 : i64, scratch_operands = 0 : i64, tpu.core_type = #tpu.core_type<tc>, window_params = [{transform_indices = @transform_0, window_bounds = array<i64: 1, 256, 128>}, {transform_indices = @transform_1, window_bounds = array<i64: 1, 128, 128>}, {transform_indices = @transform_2, window_bounds = array<i64: 1, 128, 128>}, {pipeline_mode = #tpu.pipeline_mode<synchronous>, transform_indices = @transform_3, window_bounds = array<i64: 128, 128>}, {pipeline_mode = #tpu.pipeline_mode<synchronous>, transform_indices = @transform_4, window_bounds = array<i64: 1, 128>}, {pipeline_mode = #tpu.pipeline_mode<synchronous>, transform_indices = @transform_5, window_bounds = array<i64: 128, 128>}, {pipeline_mode = #tpu.pipeline_mode<synchronous>, transform_indices = @transform_6, window_bounds = array<i64: 1, 128>}, {pipeline_mode = #tpu.pipeline_mode<synchronous>, transform_indices = @transform_7, window_bounds = array<i64: 1, 128>}, {transform_indices = @transform_8, window_bounds = array<i64: 1, 256, 128>}]} {
    %c0 = arith.constant 0 : index
    %c0_0 = arith.constant 0 : index
    %c0_1 = arith.constant 0 : index
    %0 = vector.load %arg2[%c0, %c0_0, %c0_1] : memref<1x256x128xf32, #tpu.memory_space<vmem>>, vector<1x256x128xf32>
    %1 = vector.shape_cast %0 : vector<1x256x128xf32> to vector<256x128xf32>
    %c0_2 = arith.constant 0 : index
    %c0_3 = arith.constant 0 : index
    %2 = vector.load %arg5[%c0_2, %c0_3] : memref<128x128xf32, #tpu.memory_space<vmem>>, vector<128x128xf32>
    %cst = arith.constant dense<0.000000e+00> : vector<256x128xf32>
    %3 = tpu.matmul %1, %2, %cst {dimension_numbers = #tpu.dot_dimension_numbers<[1], [0], [0], [1], [0, 0, 1, 1], [], []>} : vector<256x128xf32>, vector<128x128xf32>, vector<256x128xf32> -> vector<256x128xf32>
    %c0_4 = arith.constant 0 : index
    %c0_5 = arith.constant 0 : index
    %4 = vector.load %arg6[%c0_4, %c0_5] : memref<1x128xf32, #tpu.memory_space<vmem>>, vector<1x128xf32>
    %5 = vector.broadcast %4 : vector<1x128xf32> to vector<256x128xf32>
    %6 = arith.addf %3, %5 : vector<256x128xf32>
    %c0_6 = arith.constant 0 : index
    %c0_7 = arith.constant 0 : index
    %c0_8 = arith.constant 0 : index
    %7 = vector.load %arg3[%c0_6, %c0_7, %c0_8] : memref<1x128x128xf32, #tpu.memory_space<vmem>>, vector<1x128x128xf32>
    %8 = vector.shape_cast %7 : vector<1x128x128xf32> to vector<128x128xf32>
    %cst_9 = arith.constant dense<0.000000e+00> : vector<256x128xf32>
    %9 = tpu.matmul %6, %8, %cst_9 {dimension_numbers = #tpu.dot_dimension_numbers<[1], [1], [0], [0], [0, 0, 1, 0], [], []>} : vector<256x128xf32>, vector<128x128xf32>, vector<256x128xf32> -> vector<256x128xf32>
    %c0_10 = arith.constant 0 : index
    %c0_11 = arith.constant 0 : index
    %10 = vector.load %arg9[%c0_10, %c0_11] : memref<1x128xf32, #tpu.memory_space<vmem>>, vector<1x128xf32>
    %11 = vector.broadcast %10 : vector<1x128xf32> to vector<256x128xf32>
    %12 = arith.addf %9, %11 : vector<256x128xf32>
    %cst_12 = arith.constant dense<0xFF800000> : vector<256xf32>
    %13 = vector.multi_reduction <maximumf>, %12, %cst_12 [1] : vector<256x128xf32> to vector<256xf32>
    %14 = vector.shape_cast %13 : vector<256xf32> to vector<256x1xf32>
    %15 = vector.broadcast %14 : vector<256x1xf32> to vector<256x128xf32>
    %16 = arith.subf %12, %15 : vector<256x128xf32>
    %17 = math.exp %16 : vector<256x128xf32>
    %cst_13 = arith.constant dense<0.000000e+00> : vector<256xf32>
    %18 = vector.multi_reduction <add>, %17, %cst_13 [1] : vector<256x128xf32> to vector<256xf32>
    %19 = vector.shape_cast %18 : vector<256xf32> to vector<256x1xf32>
    %20 = tpu.reciprocal %19 {approx = true} : vector<256x1xf32> -> vector<256x1xf32>
    %21 = vector.broadcast %20 : vector<256x1xf32> to vector<256x128xf32>
    %22 = arith.mulf %17, %21 : vector<256x128xf32>
    %c0_14 = arith.constant 0 : index
    %c0_15 = arith.constant 0 : index
    %c0_16 = arith.constant 0 : index
    %23 = vector.load %arg4[%c0_14, %c0_15, %c0_16] : memref<1x128x128xf32, #tpu.memory_space<vmem>>, vector<1x128x128xf32>
    %24 = vector.shape_cast %23 : vector<1x128x128xf32> to vector<128x128xf32>
    %cst_17 = arith.constant dense<0.000000e+00> : vector<256x128xf32>
    %25 = tpu.matmul %22, %24, %cst_17 {dimension_numbers = #tpu.dot_dimension_numbers<[1], [0], [0], [1], [0, 0, 1, 1], [], []>} : vector<256x128xf32>, vector<128x128xf32>, vector<256x128xf32> -> vector<256x128xf32>
    %c0_18 = arith.constant 0 : index
    %c0_19 = arith.constant 0 : index
    %26 = vector.load %arg7[%c0_18, %c0_19] : memref<128x128xf32, #tpu.memory_space<vmem>>, vector<128x128xf32>
    %cst_20 = arith.constant dense<0.000000e+00> : vector<256x128xf32>
    %27 = tpu.matmul %25, %26, %cst_20 {dimension_numbers = #tpu.dot_dimension_numbers<[1], [0], [0], [1], [0, 0, 1, 1], [], []>} : vector<256x128xf32>, vector<128x128xf32>, vector<256x128xf32> -> vector<256x128xf32>
    %c0_21 = arith.constant 0 : index
    %c0_22 = arith.constant 0 : index
    %28 = vector.load %arg8[%c0_21, %c0_22] : memref<1x128xf32, #tpu.memory_space<vmem>>, vector<1x128xf32>
    %29 = vector.broadcast %28 : vector<1x128xf32> to vector<256x128xf32>
    %30 = arith.addf %27, %29 : vector<256x128xf32>
    %31 = arith.addf %30, %1 : vector<256x128xf32>
    %c0_23 = arith.constant 0 : index
    %c0_24 = arith.constant 0 : index
    %c0_25 = arith.constant 0 : index
    %32 = vector.load %arg10[%c0_23, %c0_24, %c0_25] : memref<1x256x128xf32, #tpu.memory_space<vmem>>, vector<1x256x128xf32>
    %33 = vector.shape_cast %32 : vector<1x256x128xf32> to vector<256x128xf32>
    %34 = vector.shape_cast %31 : vector<256x128xf32> to vector<1x256x128xf32>
    tpu.vector_store %arg10[%c0_23, %c0_24, %c0_25], %34 {strides = array<i32>} : memref<1x256x128xf32, #tpu.memory_space<vmem>>, vector<1x256x128xf32>,
    return
  }
  func.func @transform_0(%arg0: i32, %arg1: i32) -> (i32, i32, i32) {
    %c0_i32 = arith.constant 0 : i32
    %c0_i32_0 = arith.constant 0 : i32
    return %arg0, %arg1, %c0_i32 : i32, i32, i32
  }
  func.func @transform_1(%arg0: i32, %arg1: i32) -> (i32, i32, i32) {
    %c0_i32 = arith.constant 0 : i32
    %c0_i32_0 = arith.constant 0 : i32
    %c0_i32_1 = arith.constant 0 : i32
    return %arg0, %c0_i32, %c0_i32_0 : i32, i32, i32
  }
  func.func @transform_2(%arg0: i32, %arg1: i32) -> (i32, i32, i32) {
    %c0_i32 = arith.constant 0 : i32
    %c0_i32_0 = arith.constant 0 : i32
    %c0_i32_1 = arith.constant 0 : i32
    return %arg0, %c0_i32, %c0_i32_0 : i32, i32, i32
  }
  func.func @transform_3(%arg0: i32, %arg1: i32) -> (i32, i32) {
    %c0_i32 = arith.constant 0 : i32
    %c0_i32_0 = arith.constant 0 : i32
    %c0_i32_1 = arith.constant 0 : i32
    return %c0_i32, %c0_i32_0 : i32, i32
  }
  func.func @transform_4(%arg0: i32, %arg1: i32) -> (i32, i32) {
    %c0_i32 = arith.constant 0 : i32
    %c0_i32_0 = arith.constant 0 : i32
    %c0_i32_1 = arith.constant 0 : i32
    return %c0_i32, %c0_i32_0 : i32, i32
  }
  func.func @transform_5(%arg0: i32, %arg1: i32) -> (i32, i32) {
    %c0_i32 = arith.constant 0 : i32
    %c0_i32_0 = arith.constant 0 : i32
    %c0_i32_1 = arith.constant 0 : i32
    return %c0_i32, %c0_i32_0 : i32, i32
  }
  func.func @transform_6(%arg0: i32, %arg1: i32) -> (i32, i32) {
    %c0_i32 = arith.constant 0 : i32
    %c0_i32_0 = arith.constant 0 : i32
    %c0_i32_1 = arith.constant 0 : i32
    return %c0_i32, %c0_i32_0 : i32, i32
  }
  func.func @transform_7(%arg0: i32, %arg1: i32) -> (i32, i32) {
    %c0_i32 = arith.constant 0 : i32
    %c0_i32_0 = arith.constant 0 : i32
    %c0_i32_1 = arith.constant 0 : i32
    return %c0_i32, %c0_i32_0 : i32, i32
  }
  func.func @transform_8(%arg0: i32, %arg1: i32) -> (i32, i32, i32) {
    %c0_i32 = arith.constant 0 : i32
    %c0_i32_0 = arith.constant 0 : i32
    return %arg0, %arg1, %c0_i32 : i32, i32, i32
  }
}

</mosaic_0001>

<bundles_post_ra>
// kernel: tpu_custom_call.1
= control target key start
LH: loop header
LB: loop body
LE: loop exit
PB: predicated region body
PF: predicated region fallthrough
CT: control target
= control target key end

     0   :  { %s3948_s0 = inlined_call_operand.hbm [shape: f32[2,256,128], index: 0, kind: input, shape index: {}]   ;;  %s3949_s1 = inlined_call_operand.hbm [shape: f32[2,128,128], index: 1, kind: input, shape index: {}]   ;;  %s3950_s2 = inlined_call_operand.hbm [shape: f32[2,128,128], index: 2, kind: input, shape index: {}]   ;;  %s3951_s3 = inlined_call_operand.hbm [shape: f32[128,128], index: 3, kind: input, shape index: {}]   ;;  %s3952_s4 = inlined_call_operand.vmem [shape: f32[1,128], index: 4, kind: input, shape index: {}]   ;;  %s3953_s5 = inlined_call_operand.hbm [shape: f32[128,128], index: 5, kind: input, shape index: {}]   ;;  %s3954_s6 = inlined_call_operand.vmem [shape: f32[1,128], index: 6, kind: input, shape index: {}]   ;;  %s3955_s7 = inlined_call_operand.vmem [shape: f32[1,128], index: 7, kind: input, shape index: {}]   ;;  %s3956_s8 = inlined_call_operand.hbm [shape: f32[2,256,128], index: 8, kind: output, shape index: {}]  }
   0x1   :  { %3968 = sst [smem:[#allocation22_spill]] %s3949_s1 }
   0x2   :  { %3969 = sst [smem:[#allocation23_spill]] %s3950_s2 }
   0x3   :  { %3970 = sst [smem:[#allocation24_spill]] %s3951_s3 }
   0x4   :  { %3971 = sst [smem:[#allocation25_spill]] %s3956_s8 }
   0x5   :  { %13 = vsyncpa [#allocation3], 0 }
   0x6   :  { %15 = vsyncpa [#allocation3 + $0x1], 0 }
   0x7   :  { %16 = vsyncpa [#allocation6], 0 }
   0x8   :  { %18 = vsyncpa [#allocation6 + $0x1], 0 }
   0x9   :  { %19 = vsyncpa [#allocation9], 0 }
   0xa   :  { %20 = vsyncpa [#allocation4], 0 }
   0xb   :  { %22 = vsyncpa [#allocation4 + $0x1], 0  ;;  %s3100_s27 = smov 0   ;;  %s3102_s28 = smov 0  }
   0xc   :  { %s3104_s29 = smov 0   ;;  %s3106_s30 = smov 0  }
   0xd   :  { %s3108_s9 = smov 0   ;;  %s3110_s10 = smov 0  }
   0xe LB: > { %3972 = sst [smem:[#allocation16_spill]] %s3023_s27  ;;  %s3131_s11 = sadd.s32 4294967295, %s3043_s10   ;;  %s3043_s10 = sphi %s3110_s10, %s28_s10   ;;  %s3039_s9 = sphi %s3108_s9, %s4008_s9   ;;  %s3035_s30 = sphi %s3106_s30, %s4007_s30   ;;  %s3031_s29 = sphi %s3104_s29, %s4006_s29   ;;  %s3027_s28 = sphi %s3102_s28, %s4005_s28   ;;  %s3023_s27 = sphi %s3100_s27, %s4004_s27  }
   0xf   : > { %3973 = sst [smem:[#allocation17_spill]] %s3035_s30  ;;  %s1985_s12 = sadd.s32 4294967294, %s3043_s10  }
  0x10   : > { %p56_p0 = scmp.ne.s32.totalorder %s3031_s29, %s3027_s28  ;;  %p57_p1 = scmp.eq.s32.totalorder %s3043_s10, 0 }
  0x11   : > { %p62_p2 = scmp.ne.s32.totalorder %s3027_s28, %s3023_s27  ;;  %p3957_p3 = scmp.eq.s32.totalorder %s3131_s11, 0 }
  0x12   : > { %p245_p4 = scmp.eq.s32.totalorder %s3131_s11, 1  ;;  %p3142_p5 = por %p57_p1, %p56_p0 }
  0x13   : > { %p251_p6 = scmp.eq.s32.totalorder %s1985_s12, 1  ;;  %p3148_p7 = por %p3957_p3, %p62_p2 }
  0x14   : > { %p3152_p8 = por %p245_p4, %p56_p0  ;;  %p1986_p10 = scmp.ge.s32.totalorder %s3043_s10, 1 }
  0x15   : > { %p3156_p9 = por %p251_p6, %p62_p2  ;;  %p258_p11 = scmp.lt.s32.totalorder %s3043_s10, 3 }
  0x16   : > { %s3976_s16 = scalar_select %p3152_p8, 1, 0 }
  0x17   : > { %s3978_s17 = scalar_select %p3156_p9, 1, 0 }
  0x18   : > { %3977 = sst [smem:[#allocation18_spill]] %s3976_s16  ;;  %p3162_p12 = pnand %p1986_p10, %p258_p11 }
  0x19   : > { %3979 = sst [smem:[#allocation19_spill]] %s3978_s17  ;;  %s3045_s19 = smov [#allocation8]  }
  0x1a   : > { %s270_s20 = sshll.u32 %s3045_s19, 4  ;;  %p2578_p13 = pneg %p3162_p12  ;;  %s271_s20 = int_to_ptr.vmem [resolvable:$true] %s270_s20 }
  0x1b   : > { %s40_s22 = sadd.s32 1, %s3039_s9  ;;  %s3178_s23 = sand.u32 1, %s3031_s29  }
  0x1c   : > { %p3172_p4 = pnand %p2578_p13, %p3957_p3  ;;  %p3180_p2 = scmp.ge.s32.totalorder %s40_s22, 2 }
  0x1d   : > { %s2830_s25 = scalar_lea.vmem %s271_s20, 2048  ;;  %p2838_p0 = scmp.lt.s32.totalorder %s271_s20, %s271_s20 }
  0x1e   : > { %p2821_p6 = pneg %p3172_p4  ;;  %p2831_p10 = scmp.ne.s32.totalorder %s271_s20, %s2830_s25 }
  0x1f   : > { %p2839_p3 = scmp.lt.s32.totalorder %s2830_s25, %s2830_s25 }
  0x20   : > { %p2833_p11 = pnand %p2831_p10, %p2821_p6 }
  0x21   : > { %p2840_p1 = por %p2839_p3, %p2838_p0 }
  0x22   : > { %p2834_p13 = pneg %p2833_p11 }
  0x24   : > { %p2841_p9 = pnand %p2840_p1, %p2834_p13 }
  0x26   : > { %2844 = shalt.err (!%p2841_p9)
}
  0x27   : > { %s3963_s26 = smov 128   ;;  %s3965_s12 = smov 8  }
  0x28   : > { %s3983_s3 = sld [smem:[#allocation24_spill]]  ;;  %s4010_s22 = smov (%p3180_p2, %s40_s22), 0 }
  0x29   : > { %3984 = sst [smem:[#allocation20_spill]] %s4010_s22  ;;  %p3985_p3 = scmp.lt.s32.totalorder %s3043_s10, 2 }
  0x2a   : > { %s329_s17 = sand.u32 1, %s3043_s10   ;;  %s44_s27 = ssub.s32 %s3039_s9, %s4010_s22 }
  0x2b   : > { %p3205_p9 = pnand %p3985_p3, %p3142_p5  ;;  %p47_p0 = scmp.eq.s32.totalorder %s44_s27, 0 }
  0x2c   : > { %s1993_s8 = sshll.u32 %s3178_s23, 7  ;;  %s2015_s16 = sshll.u32 %s3039_s9, 11 }
  0x2d   : > { %s3987_s30 = sadd.s32 1, %s3031_s29  ;;  %s3989_s1 = sld [smem:[#allocation22_spill]] }
  0x2e   : > { %2581 = dma.hbm_to_vmem [thread:$0]  (!%p3172_p4), %s3983_s3, 2048, %s271_s20, [#allocation9], %s3963_s26, %s3963_s26, %s3965_s12  }
  0x2f   : > { %s3217_s19 = scalar_select %p47_p0, %s3031_s29, %s3987_s30  }
  0x30   : > { %s333_s25 = scalar_lea.vmem [#allocation5], %s1993_s8  ;;  %s3222_s12 = scalar_lea.sflag [#allocation6], %s329_s17 }
  0x31   : > { %3988 = sst [smem:[#allocation21_spill]] %s3217_s19  ;;  %s340_s26 = sshll.u32 %s333_s25, 4  ;;  %s341_s26 = int_to_ptr.vmem [resolvable:$true] %s340_s26 }
  0x32   : > { %p2847_p5 = pneg %p3205_p9  ;;  %s2858_s3 = scalar_lea.vmem %s341_s26, 2048 }
  0x33   : > { %s339_s14 = scalar_lea.hbm %s3989_s1, %s2015_s16  ;;  %p2859_p1 = scmp.ne.s32.totalorder %s341_s26, %s2858_s3 }
  0x34   : > { %s3048_s27 = smov [#allocation5]  }
  0x35   : > { %p2861_p2 = pnand %p2859_p1, %p2847_p5  ;;  %s2863_s30 = sshll.u32 %s3048_s27, 4  ;;  %s2864_s30 = int_to_ptr.vmem [resolvable:$false] %s2863_s30 }
  0x36   : > { %s2865_s22 = scalar_lea.vmem %s2864_s30, 4096  ;;  %p2866_p11 = scmp.lt.s32.totalorder %s341_s26, %s2864_s30 }
  0x37   : > { %p2862_p10 = pneg %p2861_p2  ;;  %p2867_p13 = scmp.lt.s32.totalorder %s2865_s22, %s2858_s3 }
  0x39   : > { %p2868_p3 = por %p2867_p13, %p2866_p11 }
  0x3b   : > { %p2869_p0 = pnand %p2868_p3, %p2862_p10 }
  0x3d   : > { %2872 = shalt.err (!%p2869_p0)
}
  0x3e   : > { %s3990_s17 = smov 8   ;;  %s3991_s20 = smov 128  }
  0x3f   : > { %2591 = dma.hbm_to_vmem [thread:$0]  (!%p3205_p9), %s339_s14, 2048, %s341_s26, %s3222_s12, %s3991_s20, %s3991_s20, %s3990_s17  }
  0x40   : > { %s3992_s2 = sld [smem:[#allocation23_spill]]  ;;  %s354_s27 = scalar_lea.vmem [#allocation7], %s1993_s8 }
  0x41   : > { %s361_s19 = sshll.u32 %s354_s27, 4  ;;  %s3049_s30 = smov [#allocation10]   ;;  %s3256_s19 = int_to_ptr.vmem [resolvable:$true] %s361_s19 }
  0x42   : > { %s286_s3 = sshll.u32 %s3049_s30, 4  ;;  %s287_s3 = int_to_ptr.vmem [resolvable:$true] %s286_s3 }
  0x43   : > { %s2884_s22 = scalar_lea.vmem %s287_s3, 2048  ;;  %p2892_p11 = scmp.lt.s32.totalorder %s287_s3, %s287_s3 }
  0x44   : > { %p2885_p1 = scmp.ne.s32.totalorder %s287_s3, %s2884_s22  ;;  %p2893_p13 = scmp.lt.s32.totalorder %s2884_s22, %s2884_s22 }
  0x46   : > { %s3238_s1 = scalar_lea.hbm %s3992_s2, %s2015_s16  ;;  %p2887_p2 = pnand %p2885_p1, %p2821_p6 }
  0x47   : > { %p2894_p3 = por %p2893_p13, %p2892_p11 }
  0x48   : > { %p2888_p10 = pneg %p2887_p2 }
  0x4a   : > { %p2895_p0 = pnand %p2894_p3, %p2888_p10 }
  0x4c   : > { %2898 = shalt.err (!%p2895_p0)
}
  0x4d   : > { %2584 = dma.hbm_to_vmem [thread:$0]  (!%p3172_p4), %s3953_s5, 2048, %s287_s3, [#allocation9], %s3991_s20, %s3991_s20, %s3990_s17  }
  0x4e   : > { %s1990_s26 = sshll.u32 %s3178_s23, 8  ;;  %s2014_s14 = sshll.u32 %s3039_s9, 12 }
  0x4f   : > { %s318_s27 = scalar_lea.hbm %s3948_s0, %s2014_s14  ;;  %s310_s21 = scalar_lea.vmem [#allocation2], %s1990_s26 }
  0x50   : > { %s319_s30 = sshll.u32 %s310_s21, 4  ;;  %s307_s22 = scalar_lea.sflag [#allocation3], %s3178_s23  ;;  %s320_s30 = int_to_ptr.vmem [resolvable:$true] %s319_s30 }
  0x51   : > { %s2912_s2 = scalar_lea.vmem %s320_s30, 4096  ;;  %s3050_s8 = smov [#allocation2]  }
  0x52   : > { %p2913_p6 = scmp.ne.s32.totalorder %s320_s30, %s2912_s2  ;;  %s2917_s3 = sshll.u32 %s3050_s8, 4  ;;  %s2918_s3 = int_to_ptr.vmem [resolvable:$false] %s2917_s3 }
  0x53   : > { %s2919_s16 = scalar_lea.vmem %s2918_s3, 8192  ;;  %p2920_p4 = scmp.lt.s32.totalorder %s320_s30, %s2918_s3 }
  0x54   : > { %p2915_p1 = pnand %p2913_p6, %p2847_p5  ;;  %p2921_p10 = scmp.lt.s32.totalorder %s2919_s16, %s2912_s2 }
  0x56   : > { %p2916_p2 = pneg %p2915_p1  ;;  %p2922_p11 = por %p2921_p10, %p2920_p4 }
  0x58   : > { %p2923_p13 = pnand %p2922_p11, %p2916_p2 }
  0x5a   : > { %2926 = shalt.err (!%p2923_p13)
}
  0x5b   : > { %2588 = dma.hbm_to_vmem [thread:$0]  (!%p3205_p9), %s318_s27, 4096, %s320_s30, %s307_s22, %s3991_s20, %s3991_s20, %s3990_s17  }
  0x5c   : > { %s2940_s23 = scalar_lea.vmem %s3256_s19, 2048  ;;  %s3051_s2 = smov [#allocation7]  }
  0x5d   : > { %p2941_p3 = scmp.ne.s32.totalorder %s3256_s19, %s2940_s23  ;;  %s2945_s26 = sshll.u32 %s3051_s2, 4  ;;  %s2946_s26 = int_to_ptr.vmem [resolvable:$false] %s2945_s26 }
  0x5e   : > { %s2947_s14 = scalar_lea.vmem %s2946_s26, 4096  ;;  %p2948_p1 = scmp.lt.s32.totalorder %s3256_s19, %s2946_s26 }
  0x5f   : > { %p2943_p0 = pnand %p2941_p3, %p2847_p5  ;;  %p2949_p2 = scmp.lt.s32.totalorder %s2947_s14, %s2940_s23 }
  0x61   : > { %p2944_p6 = pneg %p2943_p0  ;;  %p2950_p4 = por %p2949_p2, %p2948_p1 }
  0x63   : > { %p2951_p10 = pnand %p2950_p4, %p2944_p6 }
  0x65   : > { %2954 = shalt.err (!%p2951_p10)
}
  0x66   : > { %2594 = dma.hbm_to_vmem [thread:$0]  (!%p3205_p9), %s3238_s1, 2048, %s3256_s19, %s3222_s12, %s3991_s20, %s3991_s20, %s3990_s17  }
  0x67   : > { %373 = sbr.rel (%p3162_p12) target bundleno = 1327 (0x52f), region = 52  ;;  %s3284_s24 = sand.u32 (!%p3162_p12), 1, %s3027_s28  }
  0x68   : > { %s2000_s25 = sshll.u32 (!%p3162_p12), %s3284_s24, 8  ;;  %s376_s27 = scalar_lea.sflag (!%p3162_p12), [#allocation3], %s3284_s24 }
  0x69   : > { %s3290_s13 = scalar_lea.vmem (!%p3162_p12), [#allocation2], %s2000_s25 }
  0x6c   : > { %3006 = dma.done.wait (%p3148_p7), %s376_s27, 4096  }
  0x6d   : > { %3008 = vsyncadd (%p3148_p7), %s376_s27, 4294963200  ;;  %s384_s1 = sand.u32 1, %s3131_s11   ;;  %s2001_s18 = sshll.u32 %s3284_s24, 7 }
  0x6e   : > { %s385_s12 = scalar_lea.sflag [#allocation6], %s384_s1  ;;  %s3298_s19 = scalar_lea.vmem [#allocation5], %s2001_s18 }
  0x6f   : > { %3010 = dma.done.wait (%p3148_p7), %s385_s12, 4096  }
  0x70   : > { %3012 = vsyncadd (%p3148_p7), %s385_s12, 4294963200  ;;  %s3304_s17 = scalar_lea.vmem [#allocation7], %s2001_s18  ;;  %p3993_p12 = scmp.eq.s32.totalorder %s3131_s11, 0 }
  0x72   : > { %3014 = dma.done.wait (%p3993_p12), [#allocation9], 4096   ;;  %p3994_p9 = pmov %p3993_p12 }
  0x73   : > { %v497_v0 = vld [vmem:[#allocation8 + $0x78] sm:$0xff]  ;;  %v496_v1 = vld [vmem:[#allocation8 + $0x70] sm:$0xff]  ;;  %v495_v2 = vld [vmem:[#allocation8 + $0x68] sm:$0xff]  ;;  %s3798_s8 = scalar_lea.vmem [#allocation11], %s2000_s25  ;;  %s3995_s3 = sld [smem:[#allocation17_spill]] }
  0x74   : > { %3016 = vsyncadd (%p3994_p9), [#allocation9], 4294963200  ;;  %2210 = vmatprep.subr.mxu0 %v497_v0  ;;  %v494_v3 = vld [vmem:[#allocation8 + $0x60] sm:$0xff]  ;;  %v493_v5 = vld [vmem:[#allocation8 + $0x58] sm:$0xff]  ;;  %s1835_s2 = sshll.u32 %s3798_s8, 4  ;;  %s3997_s25 = sld [smem:[#allocation25_spill]]  ;;  %s3897_s2 = int_to_ptr.vmem [resolvable:$true] %s1835_s2 }
  0x75   : > { %2211 = vmatpush3.msra.mxu0 %v497_v0  ;;  %v450_v4 = vld [vmem:[%s3290_s13] sm:$0xff]  ;;  %v492_v6 = vld [vmem:[#allocation8 + $0x50] sm:$0xff]  ;;  %v491_v7 = vld [vmem:[#allocation8 + $0x48] sm:$0xff]  ;;  %s1820_s1 = scalar_lea.sflag [#allocation4], %s3284_s24  ;;  %s2955_s18 = scalar_lea.vmem %s3897_s2, 4096 }
  0x76   : > { %2212 = vmatprep.subr.mxu0 %v496_v1  ;;  %2242 = vmatprep.mubr.f32.mxu0 %v450_v4  ;;  %v490_v8 = vld [vmem:[#allocation8 + $0x40] sm:$0xff]  ;;  %v489_v9 = vld [vmem:[#allocation8 + $0x38] sm:$0xff]  ;;  %v488_v10 = vld [vmem:[#allocation8 + $0x30] sm:$0xff]  ;;  %p2956_p7 = scmp.ne.s32.totalorder %s3897_s2, %s2955_s18  ;;  %s3052_s12 = smov [#allocation11]  }
  0x77   : > { %2213 = vmatpush3.msra.mxu0 %v496_v1  ;;  %v745_v11 = vld [vmem:[%s3298_s19 + $0x78] sm:$0xff]  ;;  %v744_v12 = vld [vmem:[%s3298_s19 + $0x70] sm:$0xff]  ;;  %v487_v13 = vld [vmem:[#allocation8 + $0x28] sm:$0xff] }
  0x78   : > { %2214 = vmatprep.subr.mxu0 %v495_v2  ;;  %2290 = vmatprep.subr.mxu1 %v745_v11  ;;  %v486_v14 = vld [vmem:[#allocation8 + $0x20] sm:$0xff]  ;;  %v743_v15 = vld [vmem:[%s3298_s19 + $0x68] sm:$0xff]  ;;  %v485_v16 = vld [vmem:[#allocation8 + $0x18] sm:$0xff]  ;;  %p2957_p5 = pnand %p2956_p7, %p3152_p8 }
  0x79   : > { %2215 = vmatpush3.msra.mxu0 %v495_v2  ;;  %2291 = vmatpush3.xpose.msra.mxu1 %v745_v11  ;;  %v484_v17 = vld [vmem:[#allocation8 + $0x10] sm:$0xff]  ;;  %v742_v18 = vld [vmem:[%s3298_s19 + $0x60] sm:$0xff]  ;;  %v483_v19 = vld [vmem:[#allocation8 + $0x8] sm:$0xff]  ;;  %s2017_s16 = sshll.u32 %s3995_s3, 12 }
  0x7a   : > { %2216 = vmatprep.subr.mxu0 %v494_v3  ;;  %2292 = vmatprep.subr.mxu1 %v744_v12  ;;  %v482_v20 = vld [vmem:[#allocation8] sm:$0xff]  ;;  %v741_v21 = vld [vmem:[%s3298_s19 + $0x58] sm:$0xff]  ;;  %v451_v22 = vld [vmem:[%s3290_s13 + $0x8] sm:$0xff]  ;;  %s3895_s27 = scalar_lea.hbm %s3997_s25, %s2017_s16  ;;  %p2958_p11 = pneg %p2957_p5 }
  0x7b   : > { %2217 = vmatpush3.msra.mxu0 %v494_v3  ;;  %v452_v23 = vld [vmem:[%s3290_s13 + $0x10] sm:$0xff]  ;;  %v453_v25 = vld [vmem:[%s3290_s13 + $0x18] sm:$0xff]  ;;  %v454_v26 = vld [vmem:[%s3290_s13 + $0x20] sm:$0xff] }
  0x7c   : > { %2218 = vmatprep.subr.mxu0 %v493_v5  ;;  %v740_v24 = vld [vmem:[%s3298_s19 + $0x50] sm:$0xff]  ;;  %v739_v27 = vld [vmem:[%s3298_s19 + $0x48] sm:$0xff]  ;;  %v738_v30 = vld [vmem:[%s3298_s19 + $0x40] sm:$0xff] }
  0x7d   : > { %2219 = vmatpush3.msra.mxu0 %v493_v5  ;;  %2293 = vmatpush3.xpose.msra.mxu1 %v744_v12  ;;  %v455_v28 = vld [vmem:[%s3290_s13 + $0x28] sm:$0xff]  ;;  %v456_v29 = vld [vmem:[%s3290_s13 + $0x30] sm:$0xff]  ;;  %v457_v31 = vld [vmem:[%s3290_s13 + $0x38] sm:$0xff] }
  0x7e   : > { %2220 = vmatprep.subr.mxu0 %v492_v6  ;;  %2294 = vmatprep.subr.mxu1 %v743_v15  ;;  %v458_v32 = vld [vmem:[%s3290_s13 + $0x40] sm:$0xff]  ;;  %v737_v33 = vld [vmem:[%s3298_s19 + $0x38] sm:$0xff]  ;;  %v459_v34 = vld [vmem:[%s3290_s13 + $0x48] sm:$0xff] }
  0x7f   : > { %2221 = vmatpush3.msra.mxu0 %v492_v6  ;;  %v460_v35 = vld [vmem:[%s3290_s13 + $0x50] sm:$0xff]  ;;  %v461_v37 = vld [vmem:[%s3290_s13 + $0x58] sm:$0xff]  ;;  %v462_v38 = vld [vmem:[%s3290_s13 + $0x60] sm:$0xff] }
  0x80   : > { %2222 = vmatprep.subr.mxu0 %v491_v7  ;;  %v736_v36 = vld [vmem:[%s3298_s19 + $0x30] sm:$0xff]  ;;  %v735_v39 = vld [vmem:[%s3298_s19 + $0x28] sm:$0xff]  ;;  %v734_v42 = vld [vmem:[%s3298_s19 + $0x20] sm:$0xff] }
  0x81   : > { %2223 = vmatpush3.msra.mxu0 %v491_v7  ;;  %2295 = vmatpush3.xpose.msra.mxu1 %v743_v15  ;;  %v463_v40 = vld [vmem:[%s3290_s13 + $0x68] sm:$0xff]  ;;  %v464_v41 = vld [vmem:[%s3290_s13 + $0x70] sm:$0xff]  ;;  %v465_v43 = vld [vmem:[%s3290_s13 + $0x78] sm:$0xff] }
  0x82   : > { %2224 = vmatprep.subr.mxu0 %v490_v8  ;;  %2296 = vmatprep.subr.mxu1 %v742_v18  ;;  %v466_v44 = vld [vmem:[%s3290_s13 + $0x80] sm:$0xff]  ;;  %v733_v45 = vld [vmem:[%s3298_s19 + $0x18] sm:$0xff]  ;;  %v467_v46 = vld [vmem:[%s3290_s13 + $0x88] sm:$0xff] }
  0x83   : > { %2225 = vmatpush3.msra.mxu0 %v490_v8  ;;  %v468_v47 = vld [vmem:[%s3290_s13 + $0x90] sm:$0xff]  ;;  %v469_v49 = vld [vmem:[%s3290_s13 + $0x98] sm:$0xff]  ;;  %v470_v50 = vld [vmem:[%s3290_s13 + $0xa0] sm:$0xff] }
  0x84   : > { %2226 = vmatprep.subr.mxu0 %v489_v9  ;;  %v732_v48 = vld [vmem:[%s3298_s19 + $0x10] sm:$0xff]  ;;  %v731_v51 = vld [vmem:[%s3298_s19 + $0x8] sm:$0xff]  ;;  %v473_v54 = vld [vmem:[%s3290_s13 + $0xb8] sm:$0xff] }
  0x85   : > { %2227 = vmatpush3.msra.mxu0 %v489_v9  ;;  %2297 = vmatpush3.xpose.msra.mxu1 %v742_v18  ;;  %v471_v52 = vld [vmem:[%s3290_s13 + $0xa8] sm:$0xff]  ;;  %v472_v53 = vld [vmem:[%s3290_s13 + $0xb0] sm:$0xff]  ;;  %v474_v55 = vld [vmem:[%s3290_s13 + $0xc0] sm:$0xff] }
  0x86   : > { %2228 = vmatprep.subr.mxu0 %v488_v10  ;;  %2298 = vmatprep.subr.mxu1 %v741_v21  ;;  %v475_v56 = vld [vmem:[%s3290_s13 + $0xc8] sm:$0xff]  ;;  %v476_v57 = vld [vmem:[%s3290_s13 + $0xd0] sm:$0xff]  ;;  %v477_v58 = vld [vmem:[%s3290_s13 + $0xd8] sm:$0xff] }
  0x87   : > { %2229 = vmatpush3.msra.mxu0 %v488_v10  ;;  %v478_v59 = vld [vmem:[%s3290_s13 + $0xe0] sm:$0xff]  ;;  %v479_v60 = vld [vmem:[%s3290_s13 + $0xe8] sm:$0xff]  ;;  %v480_v61 = vld [vmem:[%s3290_s13 + $0xf0] sm:$0xff] }
  0x88   : > { %2230 = vmatprep.subr.mxu0 %v487_v13  ;;  %v481_v62 = vld [vmem:[%s3290_s13 + $0xf8] sm:$0xff]  ;;  %v730_v63 = vld [vmem:[%s3298_s19] sm:$0xff]  ;;  %s2959_s19 = sshll.u32 %s3052_s12, 4  ;;  %s2960_s19 = int_to_ptr.vmem [resolvable:$false] %s2959_s19 }
  0x89   : > { %2231 = vmatpush3.msra.mxu0 %v487_v13  ;;  %2299 = vmatpush3.xpose.msra.mxu1 %v741_v21  ;;  %v3361_v1 = vld [vmem:[%s3952_s4] ss:$0 sm:$0xff]  ;;  %p2962_p13 = scmp.lt.s32.totalorder %s3897_s2, %s2960_s19 }
  0x8a   : > { %2232 = vmatprep.subr.mxu0 %v486_v14  ;;  %2300 = vmatprep.subr.mxu1 %v740_v24 }
  0x8b   : > { %2233 = vmatpush3.msra.mxu0 %v486_v14 }
  0x8c   : > { %2234 = vmatprep.subr.mxu0 %v485_v16 }
  0x8d   : > { %2235 = vmatpush3.msra.mxu0 %v485_v16  ;;  %2301 = vmatpush3.xpose.msra.mxu1 %v740_v24 }
  0x8e   : > { %2236 = vmatprep.subr.mxu0 %v484_v17  ;;  %2302 = vmatprep.subr.mxu1 %v739_v27 }
  0x8f   : > { %2237 = vmatpush3.msra.mxu0 %v484_v17 }
  0x90   : > { %2238 = vmatprep.subr.mxu0 %v483_v19 }
  0x91   : > { %2239 = vmatpush3.msra.mxu0 %v483_v19  ;;  %2303 = vmatpush3.xpose.msra.mxu1 %v739_v27 }
  0x92   : > { %2240 = vmatprep.subr.mxu0 %v482_v20  ;;  %2304 = vmatprep.subr.mxu1 %v738_v30 }
  0x93   : > { %2241 = vmatpush3.msra.mxu0 %v482_v20 }
  0x94   : > { %2243 = vmatmul.mubr.f32.vlgmr.msra.gmra.mxu0 %v451_v22 }
  0x95   : > { %2245 = vmatprep.mubr.f32.mxu0 %v452_v23  ;;  %2305 = vmatpush3.xpose.msra.mxu1 %v738_v30 }
  0x96   : > { %2306 = vmatprep.subr.mxu1 %v737_v33 }
  0x98   : > { %2246 = vmatmul.mubr.f32.gmra.mxu0 %v453_v25 }
  0x99   : > { %2248 = vmatprep.mubr.f32.mxu0 %v454_v26  ;;  %2307 = vmatpush3.xpose.msra.mxu1 %v737_v33 }
  0x9a   : > { %2308 = vmatprep.subr.mxu1 %v736_v36 }
  0x9c   : > { %2249 = vmatmul.mubr.f32.gmra.mxu0 %v455_v28 }
  0x9d   : > { %2251 = vmatprep.mubr.f32.mxu0 %v456_v29  ;;  %2309 = vmatpush3.xpose.msra.mxu1 %v736_v36 }
  0x9e   : > { %2310 = vmatprep.subr.mxu1 %v735_v39 }
  0xa0   : > { %2252 = vmatmul.mubr.f32.gmra.mxu0 %v457_v31 }
  0xa1   : > { %2254 = vmatprep.mubr.f32.mxu0 %v458_v32  ;;  %2311 = vmatpush3.xpose.msra.mxu1 %v735_v39 }
  0xa2   : > { %2312 = vmatprep.subr.mxu1 %v734_v42 }
  0xa4   : > { %2255 = vmatmul.mubr.f32.gmra.mxu0 %v459_v34 }
  0xa5   : > { %2257 = vmatprep.mubr.f32.mxu0 %v460_v35  ;;  %2313 = vmatpush3.xpose.msra.mxu1 %v734_v42 }
  0xa6   : > { %2314 = vmatprep.subr.mxu1 %v733_v45 }
  0xa8   : > { %2258 = vmatmul.mubr.f32.gmra.mxu0 %v461_v37 }
  0xa9   : > { %2260 = vmatprep.mubr.f32.mxu0 %v462_v38  ;;  %2315 = vmatpush3.xpose.msra.mxu1 %v733_v45 }
  0xaa   : > { %2316 = vmatprep.subr.mxu1 %v732_v48 }
  0xac   : > { %2261 = vmatmul.mubr.f32.gmra.mxu0 %v463_v40 }
  0xad   : > { %2263 = vmatprep.mubr.f32.mxu0 %v464_v41  ;;  %2317 = vmatpush3.xpose.msra.mxu1 %v732_v48 }
  0xae   : > { %2318 = vmatprep.subr.mxu1 %v731_v51 }
  0xb0   : > { %2264 = vmatmul.mubr.f32.gmra.mxu0 %v465_v43 }
  0xb1   : > { %2266 = vmatprep.mubr.f32.mxu0 %v466_v44  ;;  %2319 = vmatpush3.xpose.msra.mxu1 %v731_v51 }
  0xb2   : > { %2320 = vmatprep.subr.mxu1 %v730_v63 }
  0xb4   : > { %2267 = vmatmul.mubr.f32.gmra.mxu0 %v467_v46 }
  0xb5   : > { %2269 = vmatprep.mubr.f32.mxu0 %v468_v47  ;;  %2321 = vmatpush3.xpose.msra.mxu1 %v730_v63 }
  0xb8   : > { %2270 = vmatmul.mubr.f32.gmra.mxu0 %v469_v49 }
  0xb9   : > { %2272 = vmatprep.mubr.f32.mxu0 %v470_v50 }
  0xbc   : > { %2273 = vmatmul.mubr.f32.gmra.mxu0 %v471_v52 }
  0xbd   : > { %2275 = vmatprep.mubr.f32.mxu0 %v472_v53 }
  0xc0   : > { %2276 = vmatmul.mubr.f32.gmra.mxu0 %v473_v54 }
  0xc1   : > { %2278 = vmatprep.mubr.f32.mxu0 %v474_v55 }
  0xc4   : > { %2279 = vmatmul.mubr.f32.gmra.mxu0 %v475_v56 }
  0xc5   : > { %2281 = vmatprep.mubr.f32.mxu0 %v476_v57 }
  0xc8   : > { %2282 = vmatmul.mubr.f32.gmra.mxu0 %v477_v58 }
  0xc9   : > { %2284 = vmatprep.mubr.f32.mxu0 %v478_v59 }
  0xcc   : > { %2285 = vmatmul.mubr.f32.gmra.mxu0 %v479_v60 }
  0xcd   : > { %2287 = vmatprep.mubr.f32.mxu0 %v480_v61 }
  0xd0   : > { %2288 = vmatmul.mubr.f32.gmra.mxu0 %v481_v62 }
 0x154   : > { %v2244_v0 = vpop.f32.mrf.mxu0 }
 0x155   : > { %v577_v4 = vadd.f32 %v2244_v0, %v3361_v1 }
 0x156   : > { %v571_v2 = vpop.f32.mrf.mxu0 }
 0x157   : > { %v572_v3 = vadd.f32 %v3361_v1, %v571_v2 }
 0x158   : > { %v2247_v5 = vpop.f32.mrf.mxu0 }
 0x159   : > { %2322 = vmatprep.mubr.f32.mxu1 %v572_v3  ;;  %v587_v8 = vadd.f32 %v2247_v5, %v3361_v1  ;;  %v3398_v3 = vld [vmem:[%s3955_s7] ss:$0 sm:$0xff] }
 0x15a   : > { %v581_v6 = vpop.f32.mrf.mxu0  ;;  %2323 = vmatmul.mubr.f32.vlgmr.msra.gmra.mxu1 %v577_v4 }
 0x15b   : > { %v582_v7 = vadd.f32 %v3361_v1, %v581_v6 }
 0x15c   : > { %v2250_v9 = vpop.f32.mrf.mxu0 }
 0x15d   : > { %2325 = vmatprep.mubr.f32.mxu1 %v582_v7  ;;  %v597_v10 = vadd.f32 %v2250_v9, %v3361_v1 }
 0x15e   : > { %v591_v11 = vpop.f32.mrf.mxu0  ;;  %2326 = vmatmul.mubr.f32.gmra.mxu1 %v587_v8 }
 0x15f   : > { %v592_v12 = vadd.f32 %v3361_v1, %v591_v11 }
 0x160   : > { %v2253_v13 = vpop.f32.mrf.mxu0 }
 0x161   : > { %2328 = vmatprep.mubr.f32.mxu1 %v592_v12  ;;  %v607_v14 = vadd.f32 %v2253_v13, %v3361_v1 }
 0x162   : > { %v601_v15 = vpop.f32.mrf.mxu0  ;;  %2329 = vmatmul.mubr.f32.gmra.mxu1 %v597_v10 }
 0x163   : > { %v602_v16 = vadd.f32 %v3361_v1, %v601_v15 }
 0x164   : > { %v2256_v17 = vpop.f32.mrf.mxu0 }
 0x165   : > { %2331 = vmatprep.mubr.f32.mxu1 %v602_v16  ;;  %v617_v18 = vadd.f32 %v2256_v17, %v3361_v1 }
 0x166   : > { %v611_v19 = vpop.f32.mrf.mxu0  ;;  %2332 = vmatmul.mubr.f32.gmra.mxu1 %v607_v14 }
 0x167   : > { %v612_v20 = vadd.f32 %v3361_v1, %v611_v19 }
 0x168   : > { %v2259_v21 = vpop.f32.mrf.mxu0 }
 0x169   : > { %2334 = vmatprep.mubr.f32.mxu1 %v612_v20  ;;  %v627_v22 = vadd.f32 %v2259_v21, %v3361_v1 }
 0x16a   : > { %v621_v23 = vpop.f32.mrf.mxu0  ;;  %2335 = vmatmul.mubr.f32.gmra.mxu1 %v617_v18 }
 0x16b   : > { %v622_v24 = vadd.f32 %v3361_v1, %v621_v23 }
 0x16c   : > { %v2262_v25 = vpop.f32.mrf.mxu0 }
 0x16d   : > { %2337 = vmatprep.mubr.f32.mxu1 %v622_v24  ;;  %v637_v26 = vadd.f32 %v2262_v25, %v3361_v1 }
 0x16e   : > { %v631_v27 = vpop.f32.mrf.mxu0  ;;  %2338 = vmatmul.mubr.f32.gmra.mxu1 %v627_v22 }
 0x16f   : > { %v632_v28 = vadd.f32 %v3361_v1, %v631_v27 }
 0x170   : > { %v2265_v29 = vpop.f32.mrf.mxu0 }
 0x171   : > { %2340 = vmatprep.mubr.f32.mxu1 %v632_v28  ;;  %v647_v30 = vadd.f32 %v2265_v29, %v3361_v1 }
 0x172   : > { %v641_v31 = vpop.f32.mrf.mxu0  ;;  %2341 = vmatmul.mubr.f32.gmra.mxu1 %v637_v26 }
 0x173   : > { %v642_v32 = vadd.f32 %v3361_v1, %v641_v31 }
 0x174   : > { %v2268_v33 = vpop.f32.mrf.mxu0 }
 0x175   : > { %2343 = vmatprep.mubr.f32.mxu1 %v642_v32  ;;  %v657_v34 = vadd.f32 %v2268_v33, %v3361_v1 }
 0x176   : > { %v651_v35 = vpop.f32.mrf.mxu0  ;;  %2344 = vmatmul.mubr.f32.gmra.mxu1 %v647_v30 }
 0x177   : > { %v652_v36 = vadd.f32 %v3361_v1, %v651_v35 }
 0x178   : > { %v2271_v37 = vpop.f32.mrf.mxu0 }
 0x179   : > { %2346 = vmatprep.mubr.f32.mxu1 %v652_v36  ;;  %v667_v38 = vadd.f32 %v2271_v37, %v3361_v1 }
 0x17a   : > { %v661_v39 = vpop.f32.mrf.mxu0  ;;  %2347 = vmatmul.mubr.f32.gmra.mxu1 %v657_v34 }
 0x17b   : > { %v662_v40 = vadd.f32 %v3361_v1, %v661_v39 }
 0x17c   : > { %v2274_v41 = vpop.f32.mrf.mxu0 }
 0x17d   : > { %2349 = vmatprep.mubr.f32.mxu1 %v662_v40  ;;  %v677_v42 = vadd.f32 %v2274_v41, %v3361_v1 }
 0x17e   : > { %v671_v43 = vpop.f32.mrf.mxu0  ;;  %2350 = vmatmul.mubr.f32.gmra.mxu1 %v667_v38 }
 0x17f   : > { %v672_v44 = vadd.f32 %v3361_v1, %v671_v43 }
 0x180   : > { %v2277_v45 = vpop.f32.mrf.mxu0 }
 0x181   : > { %2352 = vmatprep.mubr.f32.mxu1 %v672_v44  ;;  %v687_v46 = vadd.f32 %v2277_v45, %v3361_v1 }
 0x182   : > { %v681_v47 = vpop.f32.mrf.mxu0  ;;  %2353 = vmatmul.mubr.f32.gmra.mxu1 %v677_v42 }
 0x183   : > { %v682_v48 = vadd.f32 %v3361_v1, %v681_v47 }
 0x184   : > { %v2280_v49 = vpop.f32.mrf.mxu0 }
 0x185   : > { %2355 = vmatprep.mubr.f32.mxu1 %v682_v48  ;;  %v697_v50 = vadd.f32 %v2280_v49, %v3361_v1 }
 0x186   : > { %v691_v51 = vpop.f32.mrf.mxu0  ;;  %2356 = vmatmul.mubr.f32.gmra.mxu1 %v687_v46 }
 0x187   : > { %v692_v52 = vadd.f32 %v3361_v1, %v691_v51 }
 0x188   : > { %v2283_v53 = vpop.f32.mrf.mxu0 }
 0x189   : > { %2358 = vmatprep.mubr.f32.mxu1 %v692_v52  ;;  %v707_v54 = vadd.f32 %v2283_v53, %v3361_v1 }
 0x18a   : > { %v701_v55 = vpop.f32.mrf.mxu0  ;;  %2359 = vmatmul.mubr.f32.gmra.mxu1 %v697_v50 }
 0x18b   : > { %v702_v56 = vadd.f32 %v3361_v1, %v701_v55 }
 0x18c   : > { %v2286_v57 = vpop.f32.mrf.mxu0 }
 0x18d   : > { %2361 = vmatprep.mubr.f32.mxu1 %v702_v56  ;;  %v717_v58 = vadd.f32 %v2286_v57, %v3361_v1 }
 0x18e   : > { %v711_v59 = vpop.f32.mrf.mxu0  ;;  %2362 = vmatmul.mubr.f32.gmra.mxu1 %v707_v54 }
 0x18f   : > { %v712_v60 = vadd.f32 %v3361_v1, %v711_v59 }
 0x190   : > { %v2289_v61 = vpop.f32.mrf.mxu0 }
 0x191   : > { %2364 = vmatprep.mubr.f32.mxu1 %v712_v60  ;;  %v727_v62 = vadd.f32 %v2289_v61, %v3361_v1 }
 0x192   : > { %v721_v63 = vpop.f32.mrf.mxu0  ;;  %2365 = vmatmul.mubr.f32.gmra.mxu1 %v717_v58 }
 0x193   : > { %v722_v0 = vadd.f32 %v3361_v1, %v721_v63 }
 0x195   : > { %2367 = vmatprep.mubr.f32.mxu1 %v722_v0 }
 0x196   : > { %2368 = vmatmul.mubr.f32.gmra.mxu1 %v727_v62 }
 0x21a   : > { %v2324_v2 = vpop.f32.mrf.mxu1 }
 0x21b   : > { %v3405_v8 = vadd.f32 %v2324_v2, %v3398_v3 }
 0x21c   : > { %v819_v4 = vpop.f32.mrf.mxu1 }
 0x21d   : > { %v3401_v5 = vadd.f32 %v3398_v3, %v819_v4  ;;  %v1281_v4 = vld [vmem:[%s3304_s17 + $0x78] sm:$0xff] }
 0x21e   : > { %v2327_v6 = vpop.f32.mrf.mxu1  ;;  %2370 = vmatprep.subr.mxu0 %v1281_v4 }
 0x21f   : > { %978 = vmax.xlane.f32.xlu0 %v3401_v5  ;;  %v3413_v11 = vadd.f32 %v2327_v6, %v3398_v3  ;;  %v1280_v6 = vld [vmem:[%s3304_s17 + $0x70] sm:$0xff]  ;;  %2371 = vmatpush3.msra.mxu0 %v1281_v4 }
 0x220   : > { %v829_v7 = vpop.f32.mrf.mxu1  ;;  %2372 = vmatprep.subr.mxu0 %v1280_v6 }
 0x221   : > { %v3408_v1 = vadd.f32 %v3398_v3, %v829_v7  ;;  %v1279_v7 = vld [vmem:[%s3304_s17 + $0x68] sm:$0xff]  ;;  %2373 = vmatpush3.msra.mxu0 %v1280_v6 }
 0x222   : > { %v2330_v9 = vpop.f32.mrf.mxu1  ;;  %2374 = vmatprep.subr.mxu0 %v1279_v7 }
 0x223   : > { %982 = vmax.xlane.f32.xlu1 %v3408_v1  ;;  %980 = vmax.xlane.f32.xlu0 %v3405_v8  ;;  %v3421_v15 = vadd.f32 %v2330_v9, %v3398_v3  ;;  %v1278_v9 = vld [vmem:[%s3304_s17 + $0x60] sm:$0xff] }
 0x224   : > { %v839_v10 = vpop.f32.mrf.mxu1  ;;  %2375 = vmatpush3.msra.mxu0 %v1279_v7 }
 0x225   : > { %v3416_v12 = vadd.f32 %v3398_v3, %v839_v10  ;;  %v1277_v10 = vld [vmem:[%s3304_s17 + $0x58] sm:$0xff]  ;;  %2376 = vmatprep.subr.mxu0 %v1278_v9 }
 0x226   : > { %v2333_v13 = vpop.f32.mrf.mxu1  ;;  %2377 = vmatpush3.msra.mxu0 %v1278_v9 }
 0x227   : > { %984 = vmax.xlane.f32.xlu1 %v3413_v11  ;;  %986 = vmax.xlane.f32.xlu0 %v3416_v12  ;;  %v3429_v19 = vadd.f32 %v2333_v13, %v3398_v3  ;;  %v1275_v13 = vld [vmem:[%s3304_s17 + $0x48] sm:$0xff] }
 0x228   : > { %v849_v14 = vpop.f32.mrf.mxu1  ;;  %2378 = vmatprep.subr.mxu0 %v1277_v10 }
 0x229   : > { %v3424_v16 = vadd.f32 %v3398_v3, %v849_v14  ;;  %2379 = vmatpush3.msra.mxu0 %v1277_v10  ;;  %v1274_v14 = vld [vmem:[%s3304_s17 + $0x40] sm:$0xff] }
 0x22a   : > { %v2336_v17 = vpop.f32.mrf.mxu1 }
 0x22b   : > { %988 = vmax.xlane.f32.xlu1 %v3421_v15  ;;  %990 = vmax.xlane.f32.xlu0 %v3424_v16  ;;  %v3437_v23 = vadd.f32 %v2336_v17, %v3398_v3  ;;  %v1273_v17 = vld [vmem:[%s3304_s17 + $0x38] sm:$0xff] }
 0x22c   : > { %v859_v18 = vpop.f32.mrf.mxu1 }
 0x22d   : > { %v3432_v20 = vadd.f32 %v3398_v3, %v859_v18  ;;  %v1272_v18 = vld [vmem:[%s3304_s17 + $0x30] sm:$0xff] }
 0x22e   : > { %v2339_v21 = vpop.f32.mrf.mxu1 }
 0x22f   : > { %992 = vmax.xlane.f32.xlu1 %v3429_v19  ;;  %994 = vmax.xlane.f32.xlu0 %v3432_v20  ;;  %v3445_v27 = vadd.f32 %v2339_v21, %v3398_v3  ;;  %v1271_v21 = vld [vmem:[%s3304_s17 + $0x28] sm:$0xff] }
 0x230   : > { %v869_v22 = vpop.f32.mrf.mxu1 }
 0x231   : > { %v3440_v24 = vadd.f32 %v3398_v3, %v869_v22  ;;  %v1270_v22 = vld [vmem:[%s3304_s17 + $0x20] sm:$0xff] }
 0x232   : > { %v2342_v25 = vpop.f32.mrf.mxu1 }
 0x233   : > { %996 = vmax.xlane.f32.xlu1 %v3437_v23  ;;  %998 = vmax.xlane.f32.xlu0 %v3440_v24  ;;  %v3453_v31 = vadd.f32 %v2342_v25, %v3398_v3 }
 0x234   : > { %v879_v26 = vpop.f32.mrf.mxu1 }
 0x235   : > { %v3448_v28 = vadd.f32 %v3398_v3, %v879_v26 }
 0x236   : > { %v2345_v29 = vpop.f32.mrf.mxu1 }
 0x237   : > { %1000 = vmax.xlane.f32.xlu1 %v3445_v27  ;;  %1002 = vmax.xlane.f32.xlu0 %v3448_v28  ;;  %v3461_v35 = vadd.f32 %v2345_v29, %v3398_v3 }
 0x238   : > { %v889_v30 = vpop.f32.mrf.mxu1 }
 0x239   : > { %v3456_v32 = vadd.f32 %v3398_v3, %v889_v30 }
 0x23a   : > { %v2348_v33 = vpop.f32.mrf.mxu1 }
 0x23b   : > { %1004 = vmax.xlane.f32.xlu1 %v3453_v31  ;;  %1006 = vmax.xlane.f32.xlu0 %v3456_v32  ;;  %v3469_v39 = vadd.f32 %v2348_v33, %v3398_v3 }
 0x23c   : > { %v899_v34 = vpop.f32.mrf.mxu1 }
 0x23d   : > { %v3464_v36 = vadd.f32 %v3398_v3, %v899_v34 }
 0x23e   : > { %v2351_v37 = vpop.f32.mrf.mxu1 }
 0x23f   : > { %1008 = vmax.xlane.f32.xlu1 %v3461_v35  ;;  %1010 = vmax.xlane.f32.xlu0 %v3464_v36  ;;  %v3477_v43 = vadd.f32 %v2351_v37, %v3398_v3 }
 0x240   : > { %v909_v38 = vpop.f32.mrf.mxu1 }
 0x241   : > { %v3472_v40 = vadd.f32 %v3398_v3, %v909_v38 }
 0x242   : > { %v2354_v41 = vpop.f32.mrf.mxu1 }
 0x243   : > { %1012 = vmax.xlane.f32.xlu1 %v3469_v39  ;;  %1014 = vmax.xlane.f32.xlu0 %v3472_v40  ;;  %v3485_v47 = vadd.f32 %v2354_v41, %v3398_v3 }
 0x244   : > { %v919_v42 = vpop.f32.mrf.mxu1 }
 0x245   : > { %v3480_v44 = vadd.f32 %v3398_v3, %v919_v42 }
 0x246   : > { %v2357_v45 = vpop.f32.mrf.mxu1 }
 0x247   : > { %1016 = vmax.xlane.f32.xlu1 %v3477_v43  ;;  %1018 = vmax.xlane.f32.xlu0 %v3480_v44  ;;  %v3493_v51 = vadd.f32 %v2357_v45, %v3398_v3 }
 0x248   : > { %v929_v46 = vpop.f32.mrf.mxu1 }
 0x249   : > { %v3488_v48 = vadd.f32 %v3398_v3, %v929_v46 }
 0x24a   : > { %v2360_v49 = vpop.f32.mrf.mxu1 }
 0x24b   : > { %1020 = vmax.xlane.f32.xlu1 %v3485_v47  ;;  %1022 = vmax.xlane.f32.xlu0 %v3488_v48  ;;  %v3501_v55 = vadd.f32 %v2360_v49, %v3398_v3 }
 0x24c   : > { %v939_v50 = vpop.f32.mrf.mxu1 }
 0x24d   : > { %v3496_v52 = vadd.f32 %v3398_v3, %v939_v50 }
 0x24e   : > { %v2363_v53 = vpop.f32.mrf.mxu1 }
 0x24f   : > { %1024 = vmax.xlane.f32.xlu1 %v3493_v51  ;;  %1026 = vmax.xlane.f32.xlu0 %v3496_v52  ;;  %v3509_v59 = vadd.f32 %v2363_v53, %v3398_v3 }
 0x250   : > { %v949_v54 = vpop.f32.mrf.mxu1 }
 0x251   : > { %v3504_v56 = vadd.f32 %v3398_v3, %v949_v54 }
 0x252   : > { %v2366_v57 = vpop.f32.mrf.mxu1 }
 0x253   : > { %1028 = vmax.xlane.f32.xlu1 %v3501_v55  ;;  %1030 = vmax.xlane.f32.xlu0 %v3504_v56  ;;  %v3517_v63 = vadd.f32 %v2366_v57, %v3398_v3 }
 0x254   : > { %v959_v58 = vpop.f32.mrf.mxu1 }
 0x255   : > { %v3512_v60 = vadd.f32 %v3398_v3, %v959_v58 }
 0x256   : > { %v2369_v61 = vpop.f32.mrf.mxu1 }
 0x257   : > { %1032 = vmax.xlane.f32.xlu1 %v3509_v59  ;;  %1034 = vmax.xlane.f32.xlu0 %v3512_v60  ;;  %v3525_v2 = vadd.f32 %v2369_v61, %v3398_v3 }
 0x258   : > { %v969_v62 = vpop.f32.mrf.mxu1 }
 0x259   : > { %v3520_v0 = vadd.f32 %v3398_v3, %v969_v62  ;;  %v1276_v3 = vld [vmem:[%s3304_s17 + $0x50] sm:$0xff] }
 0x25a   : > { %2380 = vmatprep.subr.mxu0 %v1276_v3 }
 0x25b   : > { %1036 = vmax.xlane.f32.xlu1 %v3517_v63  ;;  %1038 = vmax.xlane.f32.xlu0 %v3520_v0 }
 0x25c   : > { %2381 = vmatpush3.msra.mxu0 %v1276_v3 }
 0x25d   : > { %2382 = vmatprep.subr.mxu0 %v1275_v13 }
 0x25e   : > { %2383 = vmatpush3.msra.mxu0 %v1275_v13 }
 0x25f   : > { %1040 = vmax.xlane.f32.xlu1 %v3525_v2  ;;  %2384 = vmatprep.subr.mxu0 %v1274_v14 }
 0x260   : > { %2385 = vmatpush3.msra.mxu0 %v1274_v14 }
 0x261   : > { %2386 = vmatprep.subr.mxu0 %v1273_v17 }
 0x262   : > { %2387 = vmatpush3.msra.mxu0 %v1273_v17 }
 0x263   : > { %2388 = vmatprep.subr.mxu0 %v1272_v18 }
 0x264   : > { %2389 = vmatpush3.msra.mxu0 %v1272_v18 }
 0x265   : > { %2390 = vmatprep.subr.mxu0 %v1271_v21 }
 0x266   : > { %2391 = vmatpush3.msra.mxu0 %v1271_v21 }
 0x267   : > { %2392 = vmatprep.subr.mxu0 %v1270_v22 }
 0x268   : > { %2393 = vmatpush3.msra.mxu0 %v1270_v22 }
 0x2a8   : > { %v979_v25 = vpop.xlane.xlu0 %978 }
 0x2a9   : > { %v1042_v26 = vsub.f32 %v3401_v5, %v979_v25 }
 0x2ab   : > { %v1074_v29 = vmul.f32 1.442695, %v1042_v26 }
 0x2ac   : > { %v983_v30 = vpop.xlane.xlu1 %982  ;;  %v981_v33 = vpop.xlane.xlu0 %980 }
 0x2ad   : > { %2659 = vpow2.f32 %v1074_v29  ;;  %v1044_v34 = vsub.f32 %v3408_v1, %v983_v30  ;;  %v1043_v37 = vsub.f32 %v3405_v8, %v981_v33  ;;  %v1269_v33 = vld [vmem:[%s3304_s17 + $0x18] sm:$0xff] }
 0x2ae   : > { %2394 = vmatprep.subr.mxu0 %v1269_v33 }
 0x2af   : > { %v1078_v38 = vmul.f32 1.442695, %v1044_v34  ;;  %v1076_v41 = vmul.f32 1.442695, %v1043_v37  ;;  %2395 = vmatpush3.msra.mxu0 %v1269_v33 }
 0x2b0   : > { %v985_v42 = vpop.xlane.xlu1 %984  ;;  %v987_v45 = vpop.xlane.xlu0 %986 }
 0x2b1   : > { %2661 = vpow2.f32 %v1078_v38  ;;  %v1045_v46 = vsub.f32 %v3413_v11, %v985_v42  ;;  %v1046_v49 = vsub.f32 %v3416_v12, %v987_v45 }
 0x2b2   : > { %2663 = vpow2.f32 %v1076_v41 }
 0x2b3   : > { %v1080_v50 = vmul.f32 1.442695, %v1045_v46  ;;  %v1082_v5 = vmul.f32 1.442695, %v1046_v49  ;;  %v1268_v46 = vld [vmem:[%s3304_s17 + $0x10] sm:$0xff] }
 0x2b4   : > { %v989_v53 = vpop.xlane.xlu1 %988  ;;  %v991_v54 = vpop.xlane.xlu0 %990  ;;  %2396 = vmatprep.subr.mxu0 %v1268_v46 }
 0x2b5   : > { %2665 = vpow2.f32 %v1080_v50  ;;  %v1047_v57 = vsub.f32 %v3421_v15, %v989_v53  ;;  %v1048_v1 = vsub.f32 %v3424_v16, %v991_v54  ;;  %2397 = vmatpush3.msra.mxu0 %v1268_v46 }
 0x2b6   : > { %2667 = vpow2.f32 %v1082_v5 }
 0x2b7   : > { %v1084_v8 = vmul.f32 1.442695, %v1047_v57  ;;  %v1086_v58 = vmul.f32 1.442695, %v1048_v1 }
 0x2b8   : > { %v993_v61 = vpop.xlane.xlu1 %992  ;;  %v995_v62 = vpop.xlane.xlu0 %994 }
 0x2b9   : > { %2669 = vpow2.f32 %v1084_v8  ;;  %v1049_v11 = vsub.f32 %v3429_v19, %v993_v61  ;;  %v1050_v12 = vsub.f32 %v3432_v20, %v995_v62  ;;  %v1267_v61 = vld [vmem:[%s3304_s17 + $0x8] sm:$0xff] }
 0x2ba   : > { %v3549_v4 = vpop.eup %2659  ;;  %2671 = vpow2.f32 %v1086_v58  ;;  %2398 = vmatprep.subr.mxu0 %v1267_v61 }
 0x2bb   : > { %v1088_v6 = vmul.f32 1.442695, %v1049_v11  ;;  %v1090_v7 = vmul.f32 1.442695, %v1050_v12  ;;  %1138 = vadd.xlane.f32.xlu0 %v3549_v4  ;;  %2399 = vmatpush3.msra.mxu0 %v1267_v61 }
 0x2bc   : > { %v997_v15 = vpop.xlane.xlu1 %996  ;;  %v999_v9 = vpop.xlane.xlu0 %998 }
 0x2bd   : > { %2673 = vpow2.f32 %v1088_v6  ;;  %v1051_v16 = vsub.f32 %v3437_v23, %v997_v15  ;;  %v1052_v10 = vsub.f32 %v3440_v24, %v999_v9  ;;  %v1266_v9 = vld [vmem:[%s3304_s17] sm:$0xff]  ;;  %s2961_s17 = scalar_lea.vmem %s2960_s19, 8192 }
 0x2be   : > { %v3554_v3 = vpop.eup %2661  ;;  %2675 = vpow2.f32 %v1090_v7  ;;  %2400 = vmatprep.subr.mxu0 %v1266_v9  ;;  %p2963_p3 = scmp.lt.s32.totalorder %s2961_s17, %s2955_s18 }
 0x2bf   : > { %v3556_v19 = vpop.eup %2663  ;;  %v1092_v20 = vmul.f32 1.442695, %v1051_v16  ;;  %v1094_v13 = vmul.f32 1.442695, %v1052_v10  ;;  %1142 = vadd.xlane.f32.xlu0 %v3554_v3  ;;  %2401 = vmatpush3.msra.mxu0 %v1266_v9 }
 0x2c0   : > { %1140 = vadd.xlane.f32.xlu1 %v3556_v19  ;;  %v1001_v14 = vpop.xlane.xlu1 %1000  ;;  %v1003_v17 = vpop.xlane.xlu0 %1002  ;;  %p2964_p0 = por %p2963_p3, %p2962_p13 }
 0x2c1   : > { %2677 = vpow2.f32 %v1092_v20  ;;  %v1053_v18 = vsub.f32 %v3445_v27, %v1001_v14  ;;  %v1054_v23 = vsub.f32 %v3448_v28, %v1003_v17 }
 0x2c2   : > { %v3562_v24 = vpop.eup %2665  ;;  %2679 = vpow2.f32 %v1094_v13  ;;  %p2965_p6 = pnand %p2964_p0, %p2958_p11 }
 0x2c3   : > { %v3564_v21 = vpop.eup %2667  ;;  %v1096_v22 = vmul.f32 1.442695, %v1053_v18  ;;  %v1098_v25 = vmul.f32 1.442695, %v1054_v23 }
 0x2c4   : > { %1144 = vadd.xlane.f32.xlu1 %v3562_v24  ;;  %1146 = vadd.xlane.f32.xlu0 %v3564_v21  ;;  %v1005_v26 = vpop.xlane.xlu1 %1004  ;;  %v1007_v29 = vpop.xlane.xlu0 %1006 }
 0x2c5   : > { %2681 = vpow2.f32 %v1096_v22  ;;  %v1055_v30 = vsub.f32 %v3453_v31, %v1005_v26  ;;  %v1056_v27 = vsub.f32 %v3456_v32, %v1007_v29 }
 0x2c6   : > { %v3571_v28 = vpop.eup %2669  ;;  %2683 = vpow2.f32 %v1098_v25 }
 0x2c7   : > { %v3573_v34 = vpop.eup %2671  ;;  %v1100_v37 = vmul.f32 1.442695, %v1055_v30  ;;  %v1102_v38 = vmul.f32 1.442695, %v1056_v27 }
 0x2c8   : > { %1148 = vadd.xlane.f32.xlu1 %v3571_v28  ;;  %1150 = vadd.xlane.f32.xlu0 %v3573_v34  ;;  %v1009_v41 = vpop.xlane.xlu1 %1008  ;;  %v1011_v42 = vpop.xlane.xlu0 %1010 }
 0x2c9   : > { %2685 = vpow2.f32 %v1100_v37  ;;  %v1057_v31 = vsub.f32 %v3461_v35, %v1009_v41  ;;  %v1058_v32 = vsub.f32 %v3464_v36, %v1011_v42 }
 0x2ca   : > { %v3579_v45 = vpop.eup %2673  ;;  %2687 = vpow2.f32 %v1102_v38 }
 0x2cb   : > { %v3582_v49 = vpop.eup %2675  ;;  %v1104_v50 = vmul.f32 1.442695, %v1057_v31  ;;  %v1106_v5 = vmul.f32 1.442695, %v1058_v32 }
 0x2cc   : > { %1152 = vadd.xlane.f32.xlu1 %v3579_v45  ;;  %1154 = vadd.xlane.f32.xlu0 %v3582_v49  ;;  %v1013_v53 = vpop.xlane.xlu1 %1012  ;;  %v1015_v54 = vpop.xlane.xlu0 %1014 }
 0x2cd   : > { %2689 = vpow2.f32 %v1104_v50  ;;  %v1059_v35 = vsub.f32 %v3469_v39, %v1013_v53  ;;  %v1060_v36 = vsub.f32 %v3472_v40, %v1015_v54 }
 0x2ce   : > { %v3588_v57 = vpop.eup %2677  ;;  %2691 = vpow2.f32 %v1106_v5 }
 0x2cf   : > { %v3590_v1 = vpop.eup %2679  ;;  %v1108_v8 = vmul.f32 1.442695, %v1059_v35  ;;  %v1110_v58 = vmul.f32 1.442695, %v1060_v36 }
 0x2d0   : > { %1156 = vadd.xlane.f32.xlu1 %v3588_v57  ;;  %1158 = vadd.xlane.f32.xlu0 %v3590_v1  ;;  %v1017_v62 = vpop.xlane.xlu1 %1016  ;;  %v1019_v11 = vpop.xlane.xlu0 %1018 }
 0x2d1   : > { %2693 = vpow2.f32 %v1108_v8  ;;  %v1061_v39 = vsub.f32 %v3477_v43, %v1017_v62  ;;  %v1062_v40 = vsub.f32 %v3480_v44, %v1019_v11 }
 0x2d2   : > { %v3597_v12 = vpop.eup %2681  ;;  %2695 = vpow2.f32 %v1110_v58 }
 0x2d3   : > { %v3599_v6 = vpop.eup %2683  ;;  %v1112_v7 = vmul.f32 1.442695, %v1061_v39  ;;  %v1114_v15 = vmul.f32 1.442695, %v1062_v40 }
 0x2d4   : > { %1160 = vadd.xlane.f32.xlu1 %v3597_v12  ;;  %1162 = vadd.xlane.f32.xlu0 %v3599_v6  ;;  %v1021_v16 = vpop.xlane.xlu1 %1020  ;;  %v1023_v10 = vpop.xlane.xlu0 %1022 }
 0x2d5   : > { %2697 = vpow2.f32 %v1112_v7  ;;  %v1063_v43 = vsub.f32 %v3485_v47, %v1021_v16  ;;  %v1064_v44 = vsub.f32 %v3488_v48, %v1023_v10  ;;  %v3672_v10 = vld [vmem:[#allocation10 + $0x78] sm:$0xff] }
 0x2d6   : > { %v3606_v20 = vpop.eup %2685  ;;  %2699 = vpow2.f32 %v1114_v15  ;;  %2530 = vmatprep.subr.mxu1 %v3672_v10  ;;  %2450 = vmatprep.subr.mxu0 %v3672_v10 }
 0x2d7   : > { %v3608_v13 = vpop.eup %2687  ;;  %v1116_v14 = vmul.f32 1.442695, %v1063_v43  ;;  %v1118_v17 = vmul.f32 1.442695, %v1064_v44  ;;  %2546 = vmatpush3.msra.mxu1 %v3672_v10  ;;  %v3677_v43 = vld [vmem:[#allocation10 + $0x70] sm:$0xff]  ;;  %v3681_v44 = vld [vmem:[#allocation10 + $0x68] sm:$0xff] }
 0x2d8   : > { %1164 = vadd.xlane.f32.xlu1 %v3606_v20  ;;  %1166 = vadd.xlane.f32.xlu0 %v3608_v13  ;;  %v1025_v18 = vpop.xlane.xlu1 %1024  ;;  %v1027_v23 = vpop.xlane.xlu0 %1026 }
 0x2d9   : > { %2701 = vpow2.f32 %v1116_v14  ;;  %v1065_v47 = vsub.f32 %v3493_v51, %v1025_v18  ;;  %v1066_v48 = vsub.f32 %v3496_v52, %v1027_v23  ;;  %2531 = vmatprep.subr.mxu1 %v3677_v43  ;;  %v3685_v14 = vld [vmem:[#allocation10 + $0x60] sm:$0xff]  ;;  %v3693_v18 = vld [vmem:[#allocation10 + $0x50] sm:$0xff]  ;;  %v3697_v23 = vld [vmem:[#allocation10 + $0x48] sm:$0xff] }
 0x2da   : > { %v3614_v22 = vpop.eup %2689  ;;  %2703 = vpow2.f32 %v1118_v17  ;;  %2547 = vmatpush3.msra.mxu1 %v3677_v43  ;;  %v3689_v17 = vld [vmem:[#allocation10 + $0x58] sm:$0xff] }
 0x2db   : > { %v3616_v25 = vpop.eup %2691  ;;  %v1120_v26 = vmul.f32 1.442695, %v1065_v47  ;;  %v1122_v29 = vmul.f32 1.442695, %v1066_v48  ;;  %2532 = vmatprep.subr.mxu1 %v3681_v44  ;;  %v3701_v47 = vld [vmem:[#allocation10 + $0x40] sm:$0xff]  ;;  %v3705_v48 = vld [vmem:[#allocation10 + $0x38] sm:$0xff] }
 0x2dc   : > { %1168 = vadd.xlane.f32.xlu1 %v3614_v22  ;;  %1170 = vadd.xlane.f32.xlu0 %v3616_v25  ;;  %v1029_v30 = vpop.xlane.xlu1 %1028  ;;  %v1031_v27 = vpop.xlane.xlu0 %1030 }
 0x2dd   : > { %2705 = vpow2.f32 %v1120_v26  ;;  %v1067_v33 = vsub.f32 %v3501_v55, %v1029_v30  ;;  %v1068_v51 = vsub.f32 %v3504_v56, %v1031_v27  ;;  %2548 = vmatpush3.msra.mxu1 %v3681_v44  ;;  %v3709_v26 = vld [vmem:[#allocation10 + $0x30] sm:$0xff]  ;;  %v3716_v30 = vld [vmem:[#allocation10 + $0x20] sm:$0xff]  ;;  %v3720_v27 = vld [vmem:[#allocation10 + $0x18] sm:$0xff] }
 0x2de   : > { %v3622_v37 = vpop.eup %2693  ;;  %2707 = vpow2.f32 %v1122_v29  ;;  %2533 = vmatprep.subr.mxu1 %v3685_v14  ;;  %v3713_v29 = vld [vmem:[#allocation10 + $0x28] sm:$0xff] }
 0x2df   : > { %v3624_v52 = vpop.eup %2695  ;;  %v1124_v38 = vmul.f32 1.442695, %v1067_v33  ;;  %v1126_v41 = vmul.f32 1.442695, %v1068_v51  ;;  %2549 = vmatpush3.msra.mxu1 %v3685_v14  ;;  %v3724_v33 = vld [vmem:[#allocation10 + $0x10] sm:$0xff] }
 0x2e0   : > { %1172 = vadd.xlane.f32.xlu1 %v3622_v37  ;;  %1174 = vadd.xlane.f32.xlu0 %v3624_v52  ;;  %v1033_v42 = vpop.xlane.xlu1 %1032  ;;  %v1035_v31 = vpop.xlane.xlu0 %1034 }
 0x2e1   : > { %2709 = vpow2.f32 %v1124_v38  ;;  %v1069_v32 = vsub.f32 %v3509_v59, %v1033_v42  ;;  %v1070_v55 = vsub.f32 %v3512_v60, %v1035_v31  ;;  %2534 = vmatprep.subr.mxu1 %v3689_v17 }
 0x2e2   : > { %v3630_v46 = vpop.eup %2697  ;;  %2711 = vpow2.f32 %v1126_v41  ;;  %2550 = vmatpush3.msra.mxu1 %v3689_v17 }
 0x2e3   : > { %v3632_v56 = vpop.eup %2699  ;;  %v1128_v50 = vmul.f32 1.442695, %v1069_v32  ;;  %v1130_v5 = vmul.f32 1.442695, %v1070_v55  ;;  %2535 = vmatprep.subr.mxu1 %v3693_v18 }
 0x2e4   : > { %1176 = vadd.xlane.f32.xlu1 %v3630_v46  ;;  %1178 = vadd.xlane.f32.xlu0 %v3632_v56  ;;  %v1037_v53 = vpop.xlane.xlu1 %1036  ;;  %v1039_v54 = vpop.xlane.xlu0 %1038 }
 0x2e5   : > { %2713 = vpow2.f32 %v1128_v50  ;;  %v1071_v35 = vsub.f32 %v3517_v63, %v1037_v53  ;;  %v1072_v59 = vsub.f32 %v3520_v0, %v1039_v54  ;;  %2551 = vmatpush3.msra.mxu1 %v3693_v18 }
 0x2e6   : > { %v3638_v36 = vpop.eup %2701  ;;  %2715 = vpow2.f32 %v1130_v5  ;;  %2536 = vmatprep.subr.mxu1 %v3697_v23 }
 0x2e7   : > { %v3640_v60 = vpop.eup %2703  ;;  %v1132_v8 = vmul.f32 1.442695, %v1071_v35  ;;  %v1134_v58 = vmul.f32 1.442695, %v1072_v59  ;;  %2552 = vmatpush3.msra.mxu1 %v3697_v23 }
 0x2e8   : > { %1180 = vadd.xlane.f32.xlu1 %v3638_v36  ;;  %1182 = vadd.xlane.f32.xlu0 %v3640_v60  ;;  %v1041_v61 = vpop.xlane.xlu1 %1040 }
 0x2e9   : > { %2717 = vpow2.f32 %v1132_v8  ;;  %v1073_v62 = vsub.f32 %v3525_v2, %v1041_v61  ;;  %2537 = vmatprep.subr.mxu1 %v3701_v47 }
 0x2ea   : > { %v3645_v11 = vpop.eup %2705  ;;  %2719 = vpow2.f32 %v1134_v58  ;;  %2553 = vmatpush3.msra.mxu1 %v3701_v47 }
 0x2eb   : > { %v3647_v63 = vpop.eup %2707  ;;  %v1136_v0 = vmul.f32 1.442695, %v1073_v62  ;;  %2538 = vmatprep.subr.mxu1 %v3705_v48 }
 0x2ec   : > { %1184 = vadd.xlane.f32.xlu1 %v3645_v11  ;;  %1186 = vadd.xlane.f32.xlu0 %v3647_v63 }
 0x2ed   : > { %2721 = vpow2.f32 %v1136_v0  ;;  %2554 = vmatpush3.msra.mxu1 %v3705_v48 }
 0x2ee   : > { %v3651_v39 = vpop.eup %2709  ;;  %2539 = vmatprep.subr.mxu1 %v3709_v26 }
 0x2ef   : > { %v3653_v40 = vpop.eup %2711  ;;  %2555 = vmatpush3.msra.mxu1 %v3709_v26 }
 0x2f0   : > { %1188 = vadd.xlane.f32.xlu1 %v3651_v39  ;;  %1190 = vadd.xlane.f32.xlu0 %v3653_v40 }
 0x2f1   : > { %2540 = vmatprep.subr.mxu1 %v3713_v29 }
 0x2f2   : > { %v3657_v2 = vpop.eup %2713  ;;  %2556 = vmatpush3.msra.mxu1 %v3713_v29 }
 0x2f3   : > { %v3659_v7 = vpop.eup %2715  ;;  %2541 = vmatprep.subr.mxu1 %v3716_v30 }
 0x2f4   : > { %1192 = vadd.xlane.f32.xlu1 %v3657_v2  ;;  %1194 = vadd.xlane.f32.xlu0 %v3659_v7 }
 0x2f5   : > { %2557 = vmatpush3.msra.mxu1 %v3716_v30 }
 0x2f6   : > { %v3663_v15 = vpop.eup %2717  ;;  %2542 = vmatprep.subr.mxu1 %v3720_v27 }
 0x2f7   : > { %v3665_v9 = vpop.eup %2719  ;;  %2558 = vmatpush3.msra.mxu1 %v3720_v27 }
 0x2f8   : > { %1196 = vadd.xlane.f32.xlu1 %v3663_v15  ;;  %1198 = vadd.xlane.f32.xlu0 %v3665_v9 }
 0x2f9   : > { %2543 = vmatprep.subr.mxu1 %v3724_v33 }
 0x2fa   : > { %v3669_v16 = vpop.eup %2721  ;;  %2559 = vmatpush3.msra.mxu1 %v3724_v33 }
 0x2fc   : > { %1200 = vadd.xlane.f32.xlu1 %v3669_v16 }
 0x344   : > { %v1139_v51 = vpop.xlane.xlu0 %1138 }
 0x345   : > { %2723 = vrcp.f32 %v1139_v51 }
 0x348   : > { %v1143_v38 = vpop.xlane.xlu0 %1142 }
 0x349   : > { %v1141_v41 = vpop.xlane.xlu1 %1140  ;;  %2725 = vrcp.f32 %v1143_v38 }
 0x34a   : > { %2727 = vrcp.f32 %v1141_v41 }
 0x34d   : > { %v1145_v42 = vpop.xlane.xlu1 %1144  ;;  %v1147_v31 = vpop.xlane.xlu0 %1146 }
 0x34e   : > { %2729 = vrcp.f32 %v1145_v42 }
 0x34f   : > { %2731 = vrcp.f32 %v1147_v31 }
 0x351   : > { %v1149_v32 = vpop.xlane.xlu1 %1148  ;;  %v1151_v55 = vpop.xlane.xlu0 %1150 }
 0x352   : > { %v2724_v50 = vpop.eup %2723  ;;  %2733 = vrcp.f32 %v1149_v32 }
 0x353   : > { %2735 = vrcp.f32 %v1151_v55  ;;  %v1234_v5 = vmul.f32 %v2724_v50, %v3549_v4 }
 0x355   : > { %v1153_v53 = vpop.xlane.xlu1 %1152  ;;  %v1155_v54 = vpop.xlane.xlu0 %1154  ;;  %2402 = vmatprep.mubr.f32.mxu0 %v1234_v5 }
 0x356   : > { %v2726_v35 = vpop.eup %2725  ;;  %2737 = vrcp.f32 %v1153_v53 }
 0x357   : > { %v2728_v59 = vpop.eup %2727  ;;  %2739 = vrcp.f32 %v1155_v54  ;;  %v1236_v8 = vmul.f32 %v2726_v35, %v3554_v3 }
 0x358   : > { %v1235_v58 = vmul.f32 %v2728_v59, %v3556_v19 }
 0x359   : > { %v1157_v61 = vpop.xlane.xlu1 %1156  ;;  %v1159_v62 = vpop.xlane.xlu0 %1158 }
 0x35a   : > { %2741 = vrcp.f32 %v1157_v61  ;;  %2403 = vmatmul.mubr.f32.vlgmr.msra.gmra.mxu0 %v1235_v58 }
 0x35b   : > { %v2730_v0 = vpop.eup %2729  ;;  %2743 = vrcp.f32 %v1159_v62  ;;  %2405 = vmatprep.mubr.f32.mxu0 %v1236_v8  ;;  %2451 = vmatpush3.msra.mxu0 %v3672_v10 }
 0x35c   : > { %v2732_v4 = vpop.eup %2731  ;;  %v1237_v51 = vmul.f32 %v2730_v0, %v3562_v24  ;;  %2452 = vmatprep.subr.mxu0 %v3677_v43 }
 0x35d   : > { %v1161_v38 = vpop.xlane.xlu1 %1160  ;;  %v1163_v41 = vpop.xlane.xlu0 %1162  ;;  %v1238_v3 = vmul.f32 %v2732_v4, %v3564_v21  ;;  %2453 = vmatpush3.msra.mxu0 %v3677_v43 }
 0x35e   : > { %2745 = vrcp.f32 %v1161_v38  ;;  %2406 = vmatmul.mubr.f32.gmra.mxu0 %v1237_v51  ;;  %2454 = vmatprep.subr.mxu0 %v3681_v44 }
 0x35f   : > { %v2734_v19 = vpop.eup %2733  ;;  %2747 = vrcp.f32 %v1163_v41  ;;  %2408 = vmatprep.mubr.f32.mxu0 %v1238_v3  ;;  %2455 = vmatpush3.msra.mxu0 %v3681_v44 }
 0x360   : > { %v2736_v10 = vpop.eup %2735  ;;  %v1239_v24 = vmul.f32 %v2734_v19, %v3571_v28  ;;  %2456 = vmatprep.subr.mxu0 %v3685_v14 }
 0x361   : > { %v1165_v42 = vpop.xlane.xlu1 %1164  ;;  %v1167_v31 = vpop.xlane.xlu0 %1166  ;;  %v1240_v21 = vmul.f32 %v2736_v10, %v3573_v34  ;;  %2457 = vmatpush3.msra.mxu0 %v3685_v14 }
 0x362   : > { %2749 = vrcp.f32 %v1165_v42  ;;  %2409 = vmatmul.mubr.f32.gmra.mxu0 %v1239_v24  ;;  %2458 = vmatprep.subr.mxu0 %v3689_v17 }
 0x363   : > { %v2738_v43 = vpop.eup %2737  ;;  %2751 = vrcp.f32 %v1167_v31  ;;  %2411 = vmatprep.mubr.f32.mxu0 %v1240_v21  ;;  %2459 = vmatpush3.msra.mxu0 %v3689_v17 }
 0x364   : > { %v2740_v44 = vpop.eup %2739  ;;  %v1241_v28 = vmul.f32 %v2738_v43, %v3579_v45  ;;  %2460 = vmatprep.subr.mxu0 %v3693_v18 }
 0x365   : > { %v1169_v32 = vpop.xlane.xlu1 %1168  ;;  %v1171_v55 = vpop.xlane.xlu0 %1170  ;;  %v1242_v34 = vmul.f32 %v2740_v44, %v3582_v49  ;;  %2461 = vmatpush3.msra.mxu0 %v3693_v18 }
 0x366   : > { %2753 = vrcp.f32 %v1169_v32  ;;  %2412 = vmatmul.mubr.f32.gmra.mxu0 %v1241_v28  ;;  %2462 = vmatprep.subr.mxu0 %v3697_v23 }
 0x367   : > { %v2742_v14 = vpop.eup %2741  ;;  %2755 = vrcp.f32 %v1171_v55  ;;  %2414 = vmatprep.mubr.f32.mxu0 %v1242_v34  ;;  %2463 = vmatpush3.msra.mxu0 %v3697_v23 }
 0x368   : > { %v2744_v17 = vpop.eup %2743  ;;  %v1243_v45 = vmul.f32 %v2742_v14, %v3588_v57  ;;  %2464 = vmatprep.subr.mxu0 %v3701_v47 }
 0x369   : > { %v1173_v50 = vpop.xlane.xlu1 %1172  ;;  %v1175_v5 = vpop.xlane.xlu0 %1174  ;;  %v1244_v49 = vmul.f32 %v2744_v17, %v3590_v1  ;;  %2465 = vmatpush3.msra.mxu0 %v3701_v47 }
 0x36a   : > { %2757 = vrcp.f32 %v1173_v50  ;;  %2415 = vmatmul.mubr.f32.gmra.mxu0 %v1243_v45  ;;  %2466 = vmatprep.subr.mxu0 %v3705_v48  ;;  %v1508_v45 = vld [vmem:[#allocation10 + $0x8] sm:$0xff] }
 0x36b   : > { %v2746_v18 = vpop.eup %2745  ;;  %2759 = vrcp.f32 %v1175_v5  ;;  %2417 = vmatprep.mubr.f32.mxu0 %v1244_v49  ;;  %2467 = vmatpush3.msra.mxu0 %v3705_v48 }
 0x36c   : > { %v2748_v23 = vpop.eup %2747  ;;  %v1245_v57 = vmul.f32 %v2746_v18, %v3597_v12  ;;  %2468 = vmatprep.subr.mxu0 %v3709_v26  ;;  %2544 = vmatprep.subr.mxu1 %v1508_v45 }
 0x36d   : > { %v1177_v53 = vpop.xlane.xlu1 %1176  ;;  %v1179_v54 = vpop.xlane.xlu0 %1178  ;;  %v1246_v1 = vmul.f32 %v2748_v23, %v3599_v6  ;;  %2469 = vmatpush3.msra.mxu0 %v3709_v26  ;;  %2560 = vmatpush3.msra.mxu1 %v1508_v45 }
 0x36e   : > { %2761 = vrcp.f32 %v1177_v53  ;;  %2418 = vmatmul.mubr.f32.gmra.mxu0 %v1245_v57  ;;  %2470 = vmatprep.subr.mxu0 %v3713_v29 }
 0x36f   : > { %v2750_v47 = vpop.eup %2749  ;;  %2763 = vrcp.f32 %v1179_v54  ;;  %2420 = vmatprep.mubr.f32.mxu0 %v1246_v1  ;;  %2471 = vmatpush3.msra.mxu0 %v3713_v29 }
 0x370   : > { %v2752_v48 = vpop.eup %2751  ;;  %v1247_v12 = vmul.f32 %v2750_v47, %v3606_v20  ;;  %2472 = vmatprep.subr.mxu0 %v3716_v30 }
 0x371   : > { %v1181_v35 = vpop.xlane.xlu1 %1180  ;;  %v1183_v59 = vpop.xlane.xlu0 %1182  ;;  %v1248_v6 = vmul.f32 %v2752_v48, %v3608_v13  ;;  %2473 = vmatpush3.msra.mxu0 %v3716_v30 }
 0x372   : > { %2765 = vrcp.f32 %v1181_v35  ;;  %2421 = vmatmul.mubr.f32.gmra.mxu0 %v1247_v12  ;;  %2474 = vmatprep.subr.mxu0 %v3720_v27 }
 0x373   : > { %v2754_v26 = vpop.eup %2753  ;;  %2767 = vrcp.f32 %v1183_v59  ;;  %2423 = vmatprep.mubr.f32.mxu0 %v1248_v6  ;;  %2475 = vmatpush3.msra.mxu0 %v3720_v27 }
 0x374   : > { %v2756_v29 = vpop.eup %2755  ;;  %v1249_v20 = vmul.f32 %v2754_v26, %v3614_v22  ;;  %2476 = vmatprep.subr.mxu0 %v3724_v33 }
 0x375   : > { %v1185_v8 = vpop.xlane.xlu1 %1184  ;;  %v1187_v58 = vpop.xlane.xlu0 %1186  ;;  %v1250_v13 = vmul.f32 %v2756_v29, %v3616_v25  ;;  %2477 = vmatpush3.msra.mxu0 %v3724_v33 }
 0x376   : > { %2769 = vrcp.f32 %v1185_v8  ;;  %2424 = vmatmul.mubr.f32.gmra.mxu0 %v1249_v20  ;;  %2478 = vmatprep.subr.mxu0 %v1508_v45 }
 0x377   : > { %v2758_v30 = vpop.eup %2757  ;;  %2771 = vrcp.f32 %v1187_v58  ;;  %2426 = vmatprep.mubr.f32.mxu0 %v1250_v13  ;;  %2479 = vmatpush3.msra.mxu0 %v1508_v45 }
 0x378   : > { %v2760_v61 = vpop.eup %2759  ;;  %v1251_v62 = vmul.f32 %v2758_v30, %v3622_v37 }
 0x379   : > { %v1189_v27 = vpop.xlane.xlu1 %1188  ;;  %v1191_v0 = vpop.xlane.xlu0 %1190  ;;  %v1252_v22 = vmul.f32 %v2760_v61, %v3624_v52 }
 0x37a   : > { %2773 = vrcp.f32 %v1189_v27  ;;  %2427 = vmatmul.mubr.f32.gmra.mxu0 %v1251_v62 }
 0x37b   : > { %v2762_v4 = vpop.eup %2761  ;;  %2775 = vrcp.f32 %v1191_v0  ;;  %2429 = vmatprep.mubr.f32.mxu0 %v1252_v22 }
 0x37c   : > { %v2764_v25 = vpop.eup %2763  ;;  %v1253_v33 = vmul.f32 %v2762_v4, %v3630_v46 }
 0x37d   : > { %v1193_v51 = vpop.xlane.xlu1 %1192  ;;  %v1195_v38 = vpop.xlane.xlu0 %1194  ;;  %v1254_v41 = vmul.f32 %v2764_v25, %v3632_v56  ;;  %v3791_v25 = vld [vmem:[%s3954_s6] ss:$0 sm:$0xff] }
 0x37e   : > { %2777 = vrcp.f32 %v1193_v51  ;;  %2430 = vmatmul.mubr.f32.gmra.mxu0 %v1253_v33 }
 0x37f   : > { %v2766_v3 = vpop.eup %2765  ;;  %2779 = vrcp.f32 %v1195_v38  ;;  %2432 = vmatprep.mubr.f32.mxu0 %v1254_v41  ;;  %v2787_v41 = vld [vmem:[%s3290_s13 + $0x8] sm:$0xff] }
 0x380   : > { %v2768_v37 = vpop.eup %2767  ;;  %v1255_v52 = vmul.f32 %v2766_v3, %v3638_v36 }
 0x381   : > { %v1197_v19 = vpop.xlane.xlu1 %1196  ;;  %v1199_v10 = vpop.xlane.xlu0 %1198  ;;  %v1256_v24 = vmul.f32 %v2768_v37, %v3640_v60 }
 0x382   : > { %2781 = vrcp.f32 %v1197_v19  ;;  %2433 = vmatmul.mubr.f32.gmra.mxu0 %v1255_v52  ;;  %v2788_v19 = vld [vmem:[%s3290_s13] sm:$0xff] }
 0x383   : > { %v2770_v42 = vpop.eup %2769  ;;  %2783 = vrcp.f32 %v1199_v10  ;;  %2435 = vmatprep.mubr.f32.mxu0 %v1256_v24 }
 0x384   : > { %v2772_v46 = vpop.eup %2771  ;;  %v1257_v56 = vmul.f32 %v2770_v42, %v3645_v11 }
 0x385   : > { %v1201_v31 = vpop.xlane.xlu1 %1200  ;;  %v1258_v21 = vmul.f32 %v2772_v46, %v3647_v63  ;;  %v2789_v46 = vld [vmem:[%s3290_s13 + $0x18] sm:$0xff] }
 0x386   : > { %2785 = vrcp.f32 %v1201_v31  ;;  %2436 = vmatmul.mubr.f32.gmra.mxu0 %v1257_v56 }
 0x387   : > { %v2774_v43 = vpop.eup %2773  ;;  %2438 = vmatprep.mubr.f32.mxu0 %v1258_v21 }
 0x388   : > { %v2776_v36 = vpop.eup %2775  ;;  %v1259_v44 = vmul.f32 %v2774_v43, %v3651_v39  ;;  %v2790_v43 = vld [vmem:[%s3290_s13 + $0x10] sm:$0xff] }
 0x389   : > { %v1260_v60 = vmul.f32 %v2776_v36, %v3653_v40 }
 0x38a   : > { %2439 = vmatmul.mubr.f32.gmra.mxu0 %v1259_v44 }
 0x38b   : > { %v2778_v28 = vpop.eup %2777  ;;  %2441 = vmatprep.mubr.f32.mxu0 %v1260_v60 }
 0x38c   : > { %v2780_v32 = vpop.eup %2779  ;;  %v1261_v55 = vmul.f32 %v2778_v28, %v3657_v2  ;;  %v1507_v2 = vld [vmem:[#allocation10] sm:$0xff]  ;;  %v2791_v28 = vld [vmem:[%s3290_s13 + $0x28] sm:$0xff] }
 0x38d   : > { %v1262_v11 = vmul.f32 %v2780_v32, %v3659_v7  ;;  %2480 = vmatprep.subr.mxu0 %v1507_v2  ;;  %2545 = vmatprep.subr.mxu1 %v1507_v2 }
 0x38e   : > { %2442 = vmatmul.mubr.f32.gmra.mxu0 %v1261_v55  ;;  %2561 = vmatpush3.msra.mxu1 %v1507_v2 }
 0x38f   : > { %v2782_v34 = vpop.eup %2781  ;;  %2444 = vmatprep.mubr.f32.mxu0 %v1262_v11  ;;  %2481 = vmatpush3.msra.mxu0 %v1507_v2 }
 0x390   : > { %v2784_v63 = vpop.eup %2783  ;;  %v1263_v14 = vmul.f32 %v2782_v34, %v3663_v15  ;;  %v2792_v34 = vld [vmem:[%s3290_s13 + $0x20] sm:$0xff] }
 0x391   : > { %v1264_v17 = vmul.f32 %v2784_v63, %v3665_v9 }
 0x392   : > { %2445 = vmatmul.mubr.f32.gmra.mxu0 %v1263_v14 }
 0x393   : > { %v2786_v39 = vpop.eup %2785  ;;  %2447 = vmatprep.mubr.f32.mxu0 %v1264_v17 }
 0x394   : > { %v1265_v40 = vmul.f32 %v2786_v39, %v3669_v16  ;;  %v2793_v39 = vld [vmem:[%s3290_s13 + $0x38] sm:$0xff] }
 0x396   : > { %2448 = vmatmul.mubr.f32.gmra.mxu0 %v1265_v40 }
 0x41a   : > { %v2404_v7 = vpop.f32.mrf.mxu0 }
 0x41c   : > { %v1348_v15 = vpop.f32.mrf.mxu0 }
 0x41d   : > { %2482 = vmatprep.mubr.f32.mxu0 %v1348_v15 }
 0x41e   : > { %v2407_v9 = vpop.f32.mrf.mxu0  ;;  %2483 = vmatmul.mubr.f32.vlgmr.msra.gmra.mxu0 %v2404_v7  ;;  %v2794_v7 = vld [vmem:[%s3290_s13 + $0x30] sm:$0xff] }
 0x420   : > { %v1358_v50 = vpop.f32.mrf.mxu0 }
 0x421   : > { %2485 = vmatprep.mubr.f32.mxu0 %v1358_v50 }
 0x422   : > { %v2410_v5 = vpop.f32.mrf.mxu0  ;;  %2486 = vmatmul.mubr.f32.gmra.mxu0 %v2407_v9 }
 0x424   : > { %v1368_v16 = vpop.f32.mrf.mxu0 }
 0x425   : > { %2488 = vmatprep.mubr.f32.mxu0 %v1368_v16 }
 0x426   : > { %v2413_v49 = vpop.f32.mrf.mxu0  ;;  %2489 = vmatmul.mubr.f32.gmra.mxu0 %v2410_v5  ;;  %v2795_v5 = vld [vmem:[%s3290_s13 + $0x48] sm:$0xff] }
 0x428   : > { %v1378_v18 = vpop.f32.mrf.mxu0 }
 0x429   : > { %2491 = vmatprep.mubr.f32.mxu0 %v1378_v18 }
 0x42a   : > { %v2416_v23 = vpop.f32.mrf.mxu0  ;;  %2492 = vmatmul.mubr.f32.gmra.mxu0 %v2413_v49 }
 0x42c   : > { %v1388_v57 = vpop.f32.mrf.mxu0 }
 0x42d   : > { %2494 = vmatprep.mubr.f32.mxu1 %v1388_v57 }
 0x42e   : > { %v2419_v53 = vpop.f32.mrf.mxu0  ;;  %2495 = vmatmul.mubr.f32.vlgmr.msra.gmra.mxu1 %v2416_v23  ;;  %v2796_v23 = vld [vmem:[%s3290_s13 + $0x40] sm:$0xff] }
 0x430   : > { %v1398_v54 = vpop.f32.mrf.mxu0 }
 0x431   : > { %2497 = vmatprep.mubr.f32.mxu1 %v1398_v54 }
 0x432   : > { %v2422_v1 = vpop.f32.mrf.mxu0  ;;  %2498 = vmatmul.mubr.f32.gmra.mxu1 %v2419_v53 }
 0x434   : > { %v1408_v47 = vpop.f32.mrf.mxu0 }
 0x435   : > { %2500 = vmatprep.mubr.f32.mxu1 %v1408_v47 }
 0x436   : > { %v2425_v48 = vpop.f32.mrf.mxu0  ;;  %2501 = vmatmul.mubr.f32.gmra.mxu1 %v2422_v1  ;;  %v2797_v1 = vld [vmem:[%s3290_s13 + $0x58] sm:$0xff] }
 0x438   : > { %v1418_v12 = vpop.f32.mrf.mxu0 }
 0x439   : > { %2503 = vmatprep.mubr.f32.mxu1 %v1418_v12 }
 0x43a   : > { %v2428_v35 = vpop.f32.mrf.mxu0  ;;  %2504 = vmatmul.mubr.f32.gmra.mxu1 %v2425_v48 }
 0x43c   : > { %v1428_v59 = vpop.f32.mrf.mxu0 }
 0x43d   : > { %2506 = vmatprep.mubr.f32.mxu1 %v1428_v59 }
 0x43e   : > { %v2431_v6 = vpop.f32.mrf.mxu0  ;;  %2507 = vmatmul.mubr.f32.gmra.mxu1 %v2428_v35  ;;  %v2798_v35 = vld [vmem:[%s3290_s13 + $0x50] sm:$0xff] }
 0x440   : > { %v1438_v26 = vpop.f32.mrf.mxu0 }
 0x441   : > { %2509 = vmatprep.mubr.f32.mxu1 %v1438_v26 }
 0x442   : > { %v2434_v29 = vpop.f32.mrf.mxu0  ;;  %2510 = vmatmul.mubr.f32.gmra.mxu1 %v2431_v6 }
 0x444   : > { %v1448_v20 = vpop.f32.mrf.mxu0 }
 0x445   : > { %2512 = vmatprep.mubr.f32.mxu1 %v1448_v20 }
 0x446   : > { %v2437_v8 = vpop.f32.mrf.mxu0  ;;  %2513 = vmatmul.mubr.f32.gmra.mxu1 %v2434_v29  ;;  %v2799_v29 = vld [vmem:[%s3290_s13 + $0x68] sm:$0xff] }
 0x448   : > { %v1458_v58 = vpop.f32.mrf.mxu0 }
 0x449   : > { %2515 = vmatprep.mubr.f32.mxu1 %v1458_v58 }
 0x44a   : > { %v2440_v13 = vpop.f32.mrf.mxu0  ;;  %2516 = vmatmul.mubr.f32.gmra.mxu1 %v2437_v8 }
 0x44c   : > { %v1468_v30 = vpop.f32.mrf.mxu0 }
 0x44d   : > { %2518 = vmatprep.mubr.f32.mxu1 %v1468_v30 }
 0x44e   : > { %v2443_v61 = vpop.f32.mrf.mxu0  ;;  %2519 = vmatmul.mubr.f32.gmra.mxu1 %v2440_v13  ;;  %v2800_v13 = vld [vmem:[%s3290_s13 + $0x60] sm:$0xff] }
 0x450   : > { %v1478_v62 = vpop.f32.mrf.mxu0 }
 0x451   : > { %2521 = vmatprep.mubr.f32.mxu1 %v1478_v62 }
 0x452   : > { %v2446_v27 = vpop.f32.mrf.mxu0  ;;  %2522 = vmatmul.mubr.f32.gmra.mxu1 %v2443_v61 }
 0x454   : > { %v1488_v0 = vpop.f32.mrf.mxu0 }
 0x455   : > { %2524 = vmatprep.mubr.f32.mxu1 %v1488_v0 }
 0x456   : > { %v2449_v22 = vpop.f32.mrf.mxu0  ;;  %2525 = vmatmul.mubr.f32.gmra.mxu1 %v2446_v27  ;;  %v2801_v27 = vld [vmem:[%s3290_s13 + $0x78] sm:$0xff] }
 0x458   : > { %v1498_v4 = vpop.f32.mrf.mxu0 }
 0x459   : > { %2527 = vmatprep.mubr.f32.mxu1 %v1498_v4 }
 0x45a   : > { %2528 = vmatmul.mubr.f32.gmra.mxu1 %v2449_v22 }
 0x4de   : > { %v2484_v33 = vpop.f32.mrf.mxu0 }
 0x4df   : > { %v1602_v51 = vadd.f32 %v2484_v33, %v3791_v25  ;;  %v2802_v33 = vld [vmem:[%s3290_s13 + $0x70] sm:$0xff] }
 0x4e0   : > { %v1596_v38 = vpop.f32.mrf.mxu0 }
 0x4e1   : > { %v1756_v3 = vadd.f32 %v2787_v41, %v1602_v51  ;;  %v1597_v37 = vadd.f32 %v3791_v25, %v1596_v38 }
 0x4e2   : > { %v2487_v52 = vpop.f32.mrf.mxu0 }
 0x4e3   : > { %1788 = vst [vmem:[%s3798_s8 + $0x8] sm:$0xff] %v1756_v3  ;;  %v1755_v10 = vadd.f32 %v2788_v19, %v1597_v37  ;;  %v1612_v24 = vadd.f32 %v2487_v52, %v3791_v25  ;;  %v2803_v3 = vld [vmem:[%s3290_s13 + $0x88] sm:$0xff] }
 0x4e4   : > { %v1606_v42 = vpop.f32.mrf.mxu0 }
 0x4e5   : > { %1787 = vst [vmem:[%s3798_s8] sm:$0xff] %v1755_v10  ;;  %v1758_v56 = vadd.f32 %v2789_v46, %v1612_v24  ;;  %v1607_v31 = vadd.f32 %v3791_v25, %v1606_v42  ;;  %v2804_v10 = vld [vmem:[%s3290_s13 + $0x80] sm:$0xff] }
 0x4e6   : > { %v2490_v21 = vpop.f32.mrf.mxu0 }
 0x4e7   : > { %1790 = vst [vmem:[%s3798_s8 + $0x18] sm:$0xff] %v1758_v56  ;;  %v1757_v36 = vadd.f32 %v2790_v43, %v1607_v31  ;;  %v1622_v44 = vadd.f32 %v2490_v21, %v3791_v25  ;;  %v2805_v56 = vld [vmem:[%s3290_s13 + $0x98] sm:$0xff] }
 0x4e8   : > { %v1616_v60 = vpop.f32.mrf.mxu0 }
 0x4e9   : > { %1789 = vst [vmem:[%s3798_s8 + $0x10] sm:$0xff] %v1757_v36  ;;  %v1760_v32 = vadd.f32 %v2791_v28, %v1622_v44  ;;  %v1617_v55 = vadd.f32 %v3791_v25, %v1616_v60  ;;  %v2806_v36 = vld [vmem:[%s3290_s13 + $0x90] sm:$0xff] }
 0x4ea   : > { %v2493_v11 = vpop.f32.mrf.mxu0 }
 0x4eb   : > { %1792 = vst [vmem:[%s3798_s8 + $0x28] sm:$0xff] %v1760_v32  ;;  %v1759_v63 = vadd.f32 %v2792_v34, %v1617_v55  ;;  %v1632_v14 = vadd.f32 %v2493_v11, %v3791_v25  ;;  %v2807_v32 = vld [vmem:[%s3290_s13 + $0xa8] sm:$0xff] }
 0x4ec   : > { %v1626_v17 = vpop.f32.mrf.mxu0 }
 0x4ed   : > { %1791 = vst [vmem:[%s3798_s8 + $0x20] sm:$0xff] %v1759_v63  ;;  %v1762_v40 = vadd.f32 %v2793_v39, %v1632_v14  ;;  %v1627_v45 = vadd.f32 %v3791_v25, %v1626_v17  ;;  %v2808_v63 = vld [vmem:[%s3290_s13 + $0xa0] sm:$0xff] }
 0x4ee   : > { %v2496_v2 = vpop.f32.mrf.mxu1 }
 0x4ef   : > { %1794 = vst [vmem:[%s3798_s8 + $0x38] sm:$0xff] %v1762_v40  ;;  %v1761_v15 = vadd.f32 %v2794_v7, %v1627_v45  ;;  %v1642_v9 = vadd.f32 %v2496_v2, %v3791_v25  ;;  %v2809_v40 = vld [vmem:[%s3290_s13 + $0xb8] sm:$0xff] }
 0x4f0   : > { %v1636_v50 = vpop.f32.mrf.mxu1 }
 0x4f1   : > { %1793 = vst [vmem:[%s3798_s8 + $0x30] sm:$0xff] %v1761_v15  ;;  %v1764_v16 = vadd.f32 %v2795_v5, %v1642_v9  ;;  %v1637_v49 = vadd.f32 %v3791_v25, %v1636_v50  ;;  %v2810_v15 = vld [vmem:[%s3290_s13 + $0xb0] sm:$0xff] }
 0x4f2   : > { %v2499_v18 = vpop.f32.mrf.mxu1 }
 0x4f3   : > { %1796 = vst [vmem:[%s3798_s8 + $0x48] sm:$0xff] %v1764_v16  ;;  %v1763_v57 = vadd.f32 %v2796_v23, %v1637_v49  ;;  %v1652_v53 = vadd.f32 %v2499_v18, %v3791_v25  ;;  %v2811_v16 = vld [vmem:[%s3290_s13 + $0xc8] sm:$0xff] }
 0x4f4   : > { %v1646_v54 = vpop.f32.mrf.mxu1 }
 0x4f5   : > { %1795 = vst [vmem:[%s3798_s8 + $0x40] sm:$0xff] %v1763_v57  ;;  %v1766_v47 = vadd.f32 %v2797_v1, %v1652_v53  ;;  %v1647_v48 = vadd.f32 %v3791_v25, %v1646_v54  ;;  %v2812_v57 = vld [vmem:[%s3290_s13 + $0xc0] sm:$0xff] }
 0x4f6   : > { %v2502_v12 = vpop.f32.mrf.mxu1 }
 0x4f7   : > { %1798 = vst [vmem:[%s3798_s8 + $0x58] sm:$0xff] %v1766_v47  ;;  %v1765_v59 = vadd.f32 %v2798_v35, %v1647_v48  ;;  %v1662_v6 = vadd.f32 %v2502_v12, %v3791_v25  ;;  %v2813_v47 = vld [vmem:[%s3290_s13 + $0xd8] sm:$0xff] }
 0x4f8   : > { %v1656_v26 = vpop.f32.mrf.mxu1 }
 0x4f9   : > { %1797 = vst [vmem:[%s3798_s8 + $0x50] sm:$0xff] %v1765_v59  ;;  %v1768_v20 = vadd.f32 %v2799_v29, %v1662_v6  ;;  %v1657_v8 = vadd.f32 %v3791_v25, %v1656_v26  ;;  %v2814_v59 = vld [vmem:[%s3290_s13 + $0xd0] sm:$0xff] }
 0x4fa   : > { %v2505_v58 = vpop.f32.mrf.mxu1 }
 0x4fb   : > { %1800 = vst [vmem:[%s3798_s8 + $0x68] sm:$0xff] %v1768_v20  ;;  %v1767_v30 = vadd.f32 %v2800_v13, %v1657_v8  ;;  %v1672_v61 = vadd.f32 %v2505_v58, %v3791_v25  ;;  %v2815_v20 = vld [vmem:[%s3290_s13 + $0xe8] sm:$0xff] }
 0x4fc   : > { %v1666_v62 = vpop.f32.mrf.mxu1 }
 0x4fd   : > { %1799 = vst [vmem:[%s3798_s8 + $0x60] sm:$0xff] %v1767_v30  ;;  %v1770_v0 = vadd.f32 %v2801_v27, %v1672_v61  ;;  %v1667_v22 = vadd.f32 %v3791_v25, %v1666_v62  ;;  %v2816_v30 = vld [vmem:[%s3290_s13 + $0xe0] sm:$0xff] }
 0x4fe   : > { %v2508_v4 = vpop.f32.mrf.mxu1 }
 0x4ff   : > { %1802 = vst [vmem:[%s3798_s8 + $0x78] sm:$0xff] %v1770_v0  ;;  %v1769_v51 = vadd.f32 %v2802_v33, %v1667_v22  ;;  %v1682_v38 = vadd.f32 %v2508_v4, %v3791_v25  ;;  %v2817_v0 = vld [vmem:[%s3290_s13 + $0xf8] sm:$0xff]  ;;  %v2818_v33 = vld [vmem:[%s3290_s13 + $0xf0] sm:$0xff] }
 0x500   : > { %v1676_v41 = vpop.f32.mrf.mxu1 }
 0x501   : > { %1801 = vst [vmem:[%s3798_s8 + $0x70] sm:$0xff] %v1769_v51  ;;  %v1772_v37 = vadd.f32 %v2803_v3, %v1682_v38  ;;  %v1677_v52 = vadd.f32 %v3791_v25, %v1676_v41 }
 0x502   : > { %v2511_v19 = vpop.f32.mrf.mxu1 }
 0x503   : > { %1804 = vst [vmem:[%s3798_s8 + $0x88] sm:$0xff] %v1772_v37  ;;  %v1771_v24 = vadd.f32 %v2804_v10, %v1677_v52  ;;  %v1692_v42 = vadd.f32 %v2511_v19, %v3791_v25 }
 0x504   : > { %v1686_v46 = vpop.f32.mrf.mxu1 }
 0x505   : > { %1803 = vst [vmem:[%s3798_s8 + $0x80] sm:$0xff] %v1771_v24  ;;  %v1774_v31 = vadd.f32 %v2805_v56, %v1692_v42  ;;  %v1687_v21 = vadd.f32 %v3791_v25, %v1686_v46 }
 0x506   : > { %v2514_v43 = vpop.f32.mrf.mxu1 }
 0x507   : > { %1806 = vst [vmem:[%s3798_s8 + $0x98] sm:$0xff] %v1774_v31  ;;  %v1773_v44 = vadd.f32 %v2806_v36, %v1687_v21  ;;  %v1702_v60 = vadd.f32 %v2514_v43, %v3791_v25 }
 0x508   : > { %v1696_v28 = vpop.f32.mrf.mxu1 }
 0x509   : > { %1805 = vst [vmem:[%s3798_s8 + $0x90] sm:$0xff] %v1773_v44  ;;  %v1776_v55 = vadd.f32 %v2807_v32, %v1702_v60  ;;  %v1697_v11 = vadd.f32 %v3791_v25, %v1696_v28 }
 0x50a   : > { %v2517_v34 = vpop.f32.mrf.mxu1 }
 0x50b   : > { %1808 = vst [vmem:[%s3798_s8 + $0xa8] sm:$0xff] %v1776_v55  ;;  %v1775_v14 = vadd.f32 %v2808_v63, %v1697_v11  ;;  %v1712_v17 = vadd.f32 %v2517_v34, %v3791_v25 }
 0x50c   : > { %v1706_v39 = vpop.f32.mrf.mxu1 }
 0x50d   : > { %1807 = vst [vmem:[%s3798_s8 + $0xa0] sm:$0xff] %v1775_v14  ;;  %v1778_v45 = vadd.f32 %v2809_v40, %v1712_v17  ;;  %v1707_v2 = vadd.f32 %v3791_v25, %v1706_v39 }
 0x50e   : > { %v2520_v7 = vpop.f32.mrf.mxu1 }
 0x50f   : > { %1810 = vst [vmem:[%s3798_s8 + $0xb8] sm:$0xff] %v1778_v45  ;;  %v1777_v9 = vadd.f32 %v2810_v15, %v1707_v2  ;;  %v1722_v50 = vadd.f32 %v2520_v7, %v3791_v25 }
 0x510   : > { %v1716_v5 = vpop.f32.mrf.mxu1 }
 0x511   : > { %1809 = vst [vmem:[%s3798_s8 + $0xb0] sm:$0xff] %v1777_v9  ;;  %v1780_v49 = vadd.f32 %v2811_v16, %v1722_v50  ;;  %v1717_v18 = vadd.f32 %v3791_v25, %v1716_v5 }
 0x512   : > { %v2523_v23 = vpop.f32.mrf.mxu1 }
 0x513   : > { %1812 = vst [vmem:[%s3798_s8 + $0xc8] sm:$0xff] %v1780_v49  ;;  %v1779_v53 = vadd.f32 %v2812_v57, %v1717_v18  ;;  %v1732_v54 = vadd.f32 %v2523_v23, %v3791_v25 }
 0x514   : > { %v1726_v1 = vpop.f32.mrf.mxu1 }
 0x515   : > { %1811 = vst [vmem:[%s3798_s8 + $0xc0] sm:$0xff] %v1779_v53  ;;  %v1782_v48 = vadd.f32 %v2813_v47, %v1732_v54  ;;  %v1727_v12 = vadd.f32 %v3791_v25, %v1726_v1 }
 0x516   : > { %v2526_v35 = vpop.f32.mrf.mxu1 }
 0x517   : > { %1814 = vst [vmem:[%s3798_s8 + $0xd8] sm:$0xff] %v1782_v48  ;;  %v1781_v6 = vadd.f32 %v2814_v59, %v1727_v12  ;;  %v1742_v26 = vadd.f32 %v2526_v35, %v3791_v25 }
 0x518   : > { %v1736_v29 = vpop.f32.mrf.mxu1 }
 0x519   : > { %1813 = vst [vmem:[%s3798_s8 + $0xd0] sm:$0xff] %v1781_v6  ;;  %v1784_v8 = vadd.f32 %v2815_v20, %v1742_v26  ;;  %v1737_v58 = vadd.f32 %v3791_v25, %v1736_v29 }
 0x51a   : > { %v2529_v13 = vpop.f32.mrf.mxu1 }
 0x51b   : > { %1816 = vst [vmem:[%s3798_s8 + $0xe8] sm:$0xff] %v1784_v8  ;;  %v1783_v61 = vadd.f32 %v2816_v30, %v1737_v58  ;;  %v1752_v62 = vadd.f32 %v2529_v13, %v3791_v25 }
 0x51c   : > { %v1746_v27 = vpop.f32.mrf.mxu1 }
 0x51d   : > { %1815 = vst [vmem:[%s3798_s8 + $0xe0] sm:$0xff] %v1783_v61  ;;  %v1786_v22 = vadd.f32 %v2817_v0, %v1752_v62  ;;  %v1747_v4 = vadd.f32 %v3791_v25, %v1746_v27 }
 0x51f   : > { %1818 = vst [vmem:[%s3798_s8 + $0xf8] sm:$0xff] %v1786_v22  ;;  %v1785_v51 = vadd.f32 %v2818_v33, %v1747_v4 }
 0x521   : > { %1817 = vst [vmem:[%s3798_s8 + $0xf0] sm:$0xff] %v1785_v51 }
 0x522   : > { %2968 = shalt.err (!%p2965_p6)
}
 0x523   : > { %s2969_s13 = scalar_lea.hbm %s3895_s27, 4096  ;;  %s2973_s20 = scalar_lea.hbm %s3997_s25, 8192 }
 0x524   : > { %p2970_p1 = scmp.ne.s32.totalorder %s3895_s27, %s2969_s13  ;;  %p2974_p10 = scmp.lt.s32.totalorder %s3895_s27, %s3997_s25 }
 0x525   : > { %p2975_p12 = scmp.lt.s32.totalorder %s2973_s20, %s2969_s13 }
 0x526   : > { %p2971_p2 = pnand %p2970_p1, %p3152_p8 }
 0x527   : > { %p2976_p9 = por %p2975_p12, %p2974_p10 }
 0x528   : > { %p2972_p4 = pneg %p2971_p2 }
 0x52a   : > { %p2977_p7 = pnand %p2976_p9, %p2972_p4 }
 0x52c   : > { %2980 = shalt.err (!%p2977_p7)
}
 0x52d   : > { %s3053_s22 = smov 128   ;;  %s3054_s8 = smov 8  }
 0x52e   : > { %2576 = dma.vmem_to_hbm [thread:$0]  (%p3152_p8), %s3897_s2, 4096, %s3895_s27, %s1820_s1, %s3053_s22, %s3053_s22, %s3054_s8  }
 0x52f PF: > { %s3998_s3 = sld [smem:[#allocation16_spill]]  ;;  %p4001_p11 = scmp.ge.s32.totalorder %s3043_s10, 2 }
 0x530   : > { %s3999_s16 = sld [smem:[#allocation19_spill]] }
 0x535   : > { %s1850_s26 = sand.u32 1, %s3998_s3  }
 0x536   : > { %p4000_p5 = scmp.ne.s32.totalorder %s3999_s16, 0  ;;  %s1851_s14 = scalar_lea.sflag [#allocation4], %s1850_s26 }
 0x538   : > { %p2596_p13 = pnand %p4001_p11, %p4000_p5 }
 0x53a   : > { %p2597_p3 = pneg %p2596_p13 }
 0x53c   : > { %3018 = dma.done.wait (%p2597_p3), %s1851_s14, 4096  }
 0x53d   : > { %3020 = vsyncadd (%p2597_p3), %s1851_s14, 4294963200  ;;  %s28_s10 = sadd.s32 1, %s3043_s10   ;;  %s4002_s23 = sld [smem:[#allocation21_spill]] }
 0x53e   : > { %p25_p0 = scmp.ge.s32.totalorder %s28_s10, 4   ;;  %s4003_s24 = sld [smem:[#allocation20_spill]] }
 0x53f   : > { %s4004_s27 = smov %s3027_s28  ;;  %s4005_s28 = smov %s3031_s29 }
 0x540   : > { %s4007_s30 = smov %s3039_s9  ;;  %27 = sbr.rel (!%p25_p0) target bundleno = 14 (0xe), region = 129 }
 0x543   : > { %s4006_s29 = smov %s4002_s23 }
 0x544   : > { %s4008_s9 = smov %s4003_s24 }
 0x545   :  { %1856 = vsyncpa [#allocation3], 1 }
 0x546   :  { %1858 = vsyncpa [#allocation3 + $0x1], 1 }
 0x547   :  { %1859 = vsyncpa [#allocation6], 1 }
 0x548   :  { %1861 = vsyncpa [#allocation6 + $0x1], 1 }
 0x549   :  { %1862 = vsyncpa [#allocation9], 1 }
 0x54a   :  { %1863 = vsyncpa [#allocation4], 1 }
 0x54b   :  { %1865 = vsyncpa [#allocation4 + $0x1], 1 }

</bundles_post_ra>
